<compile_context>
chip_gen: v7x
topology: tpu7x:2x2x1
jax: 0.10.0
libtpu: 0.0.40
codegen_flags: <defaults>
</compile_context>

<pallas_src>
import functools
import math

import jax
import jax.numpy as jnp
from jax.experimental import pallas as pl
from jax.experimental.pallas import tpu as pltpu  # only needed when scaling up (see note above)

# ---------------- synthetic encoder config (small shapes) ----------------
VOCAB = 100
HIDDEN = 32
SEQ = 8
BATCH = 2
LAYERS = 2
NUM_HEADS = 2
HEAD_DIM = HIDDEN // NUM_HEADS  # 16
INTER = 64

# pl.reciprocal(approx=True) -> attention probabilities sum to 1 only to ~1e-3
# relative accuracy (deliberate divergence from the exact HF softmax).
_APPROX_RECIP = True


# ---------------------------- kernel helpers ------------------------------
def _layer_norm(x, gamma, beta, eps=1e-12):
    mu = jnp.mean(x, axis=-1, keepdims=True)
    var = jnp.mean((x - mu) ** 2, axis=-1, keepdims=True)
    return (x - mu) * jax.lax.rsqrt(var + eps) * gamma + beta


def _gelu(x):
    # TODO(synk): HF BERT's default GELU is the exact erf form; the tanh
    # approximation is used here (lowers cleanly to the EUP, ~1e-3 rel. diff).
    c = jnp.float32(0.7978845608028654)  # sqrt(2/pi)
    return 0.5 * x * (1.0 + jnp.tanh(c * (x + 0.044715 * x * x * x)))


def _recip(x):
    return pl.reciprocal(x, approx=True) if _APPROX_RECIP else 1.0 / x


# ------------------------------ Pallas kernel ------------------------------
def encoder_kernel(
    x_ref, mask_ref, emb_g_ref, emb_b_ref,
    wqkv_ref, bqkv_ref, wo_ref, bo_ref, ln1g_ref, ln1b_ref,
    w1_ref, b1_ref, w2_ref, b2_ref, ln2g_ref, ln2b_ref,
    out_ref,
    *, num_layers, num_heads, head_dim, representation):
    # Both towers are folded into the leading (row) dimension: TB = towers*batch.
    TB, S = mask_ref.shape
    H = num_heads * head_dim
    mask = mask_ref[...]                                  # (TB, S) f32
    x = x_ref[...]                                        # (TB*S, H) f32

    # embedding layer-norm
    h = _layer_norm(x, emb_g_ref[...], emb_b_ref[...])

    # additive attention mask over key positions, hoisted out of the layer loop
    # at its final broadcast shape.  Heads live on the einsum batch axis
    # (head-major), so the bias is replicated per head once: (NH*TB, 1, S).
    bias_b = ((1.0 - mask) * jnp.float32(-1e9))[:, None, :]       # (TB, 1, S)
    bias = jnp.concatenate([bias_b] * num_heads, axis=0)          # (NH*TB, 1, S)

    def split_heads(qkv, comp):
        # Take component `comp` (0=q, 1=k, 2=v) out of the fused (TB*S, 3H)
        # projection and stack its heads on the batch axis:
        # -> (NH*TB, S, head_dim), bf16 for the MXU.
        parts = [
            qkv[:, comp * H + hh * head_dim: comp * H + (hh + 1) * head_dim]
            .reshape(TB, S, head_dim)
            for hh in range(num_heads)
        ]
        return jnp.concatenate(parts, axis=0).astype(jnp.bfloat16)

    for l in range(num_layers):
        hb = h.astype(jnp.bfloat16)

        # ---- fused Q|K|V projection: ONE lane-dense (H, 3H) matmul.
        #      1/sqrt(head_dim) is folded into the q slice by the wrapper.
        qkv = jnp.dot(hb, wqkv_ref[l],
                      preferred_element_type=jnp.float32) + bqkv_ref[l]
        q = split_heads(qkv, 0)
        k = split_heads(qkv, 1)
        v = split_heads(qkv, 2)

        # ---- all heads at once: two batched einsums (batch dim = NH*TB).
        scores = jnp.einsum('bqd,bkd->bqk', q, k,
                            preferred_element_type=jnp.float32) + bias
        scores = scores - jnp.max(scores, axis=-1, keepdims=True)
        p = jnp.exp(scores)
        p = p * _recip(jnp.sum(p, axis=-1, keepdims=True))
        ctx = jnp.einsum('bqk,bkd->bqd', p.astype(jnp.bfloat16), v,
                         preferred_element_type=jnp.float32)      # (NH*TB, S, HD)

        # unfold heads back onto the lane (feature) axis -> (TB*S, H)
        ctx_full = jnp.concatenate(
            [ctx[hh * TB:(hh + 1) * TB].reshape(TB * S, head_dim)
             for hh in range(num_heads)], axis=-1)

        # ---- output projection + residual + LN
        attn = jnp.dot(ctx_full.astype(jnp.bfloat16), wo_ref[l],
                       preferred_element_type=jnp.float32) + bo_ref[l]
        h = _layer_norm(h + attn, ln1g_ref[l], ln1b_ref[l])

        # ---- feed-forward + residual + LN
        hb = h.astype(jnp.bfloat16)
        f = _gelu(jnp.dot(hb, w1_ref[l],
                          preferred_element_type=jnp.float32) + b1_ref[l])
        f = jnp.dot(f.astype(jnp.bfloat16), w2_ref[l],
                    preferred_element_type=jnp.float32) + b2_ref[l]
        h = _layer_norm(h + f, ln2g_ref[l], ln2b_ref[l])

    # ---- pooling (matches Encoder.get_representation)
    # NOTE: output trailing dim is 32 -> masked store; at (TB, 32) = 512 bytes
    # the lane-dense (1, TB*H) repack would cost more relayout than it saves.
    h3 = h.reshape(TB, S, H)
    if representation == 'cls':
        out_ref[...] = h3[:, 0, :]
    else:  # 'mean'
        s = jnp.sum(h3 * mask[:, :, None], axis=1)                  # (TB, H)
        d = jnp.maximum(jnp.sum(mask, axis=1, keepdims=True), 1.0)  # guard 0/0
        pooled = s * _recip(d)
        inv_nrm = jax.lax.rsqrt(
            jnp.maximum(jnp.sum(pooled * pooled, axis=-1, keepdims=True),
                        jnp.float32(1e-24)))
        out_ref[...] = pooled * inv_nrm                   # F.normalize(dim=-1)


# --------------------------- parameter creation ----------------------------
def init_params(key):
    ks = jax.random.split(key, 8)
    n = lambda k, shape: jax.random.normal(k, shape, jnp.float32) * 0.02
    # Q/K/V/O weights are stored head-fused: last (lane) dim = HIDDEN.
    return {
        'word_emb': n(ks[0], (VOCAB, HIDDEN)),
        'pos_emb': n(ks[1], (SEQ, HIDDEN)),
        'emb_g': jnp.ones((1, HIDDEN), jnp.float32),
        'emb_b': jnp.zeros((1, HIDDEN), jnp.float32),
        'wq': n(ks[2], (LAYERS, HIDDEN, HIDDEN)),
        'bq': jnp.zeros((LAYERS, 1, HIDDEN), jnp.float32),
        'wk': n(ks[3], (LAYERS, HIDDEN, HIDDEN)),
        'bk': jnp.zeros((LAYERS, 1, HIDDEN), jnp.float32),
        'wv': n(ks[4], (LAYERS, HIDDEN, HIDDEN)),
        'bv': jnp.zeros((LAYERS, 1, HIDDEN), jnp.float32),
        'wo': n(ks[5], (LAYERS, HIDDEN, HIDDEN)),
        'bo': jnp.zeros((LAYERS, 1, HIDDEN), jnp.float32),
        'ln1g': jnp.ones((LAYERS, 1, HIDDEN), jnp.float32),
        'ln1b': jnp.zeros((LAYERS, 1, HIDDEN), jnp.float32),
        'w1': n(ks[6], (LAYERS, HIDDEN, INTER)),
        'b1': jnp.zeros((LAYERS, 1, INTER), jnp.float32),
        'w2': n(ks[7], (LAYERS, INTER, HIDDEN)),
        'b2': jnp.zeros((LAYERS, 1, HIDDEN), jnp.float32),
        'ln2g': jnp.ones((LAYERS, 1, HIDDEN), jnp.float32),
        'ln2b': jnp.zeros((LAYERS, 1, HIDDEN), jnp.float32),
    }


# ------------------------------ wrapper glue --------------------------------
def encode_towers(ids, attn_mask, params, representation='cls'):
    """ids/attn_mask: (T, B, S).  Both towers run in ONE ungridded pallas_call;
    the tower axis T is folded into the matmul row dimension (T*B*S rows)."""
    T, B, S = ids.shape
    TB = T * B
    # embedding gather (glue, plain JAX)
    x = params['word_emb'][ids] + params['pos_emb'][None, None, :S, :]  # (T,B,S,H)
    x2d = x.reshape(TB * S, HIDDEN)
    mask2d = attn_mask.astype(jnp.float32).reshape(TB, S)

    bf = jnp.bfloat16
    scale = jnp.float32(1.0 / math.sqrt(HEAD_DIM))  # fold 1/sqrt(d) into q slice
    # fused Q|K|V weight / bias: one (H, 3H) matmul per layer in the kernel
    wqkv = jnp.concatenate(
        [params['wq'] * scale, params['wk'], params['wv']], axis=-1).astype(bf)
    bqkv = jnp.concatenate(
        [params['bq'] * scale, params['bk'], params['bv']], axis=-1)

    weight_args = (
        params['emb_g'], params['emb_b'],
        wqkv, bqkv,
        params['wo'].astype(bf), params['bo'],
        params['ln1g'], params['ln1b'],
        params['w1'].astype(bf), params['b1'],
        params['w2'].astype(bf), params['b2'],
        params['ln2g'], params['ln2b'],
    )

    kernel = functools.partial(
        encoder_kernel,
        num_layers=LAYERS, num_heads=NUM_HEADS, head_dim=HEAD_DIM,
        representation=representation)

    # rough advisory cost for the XLA scheduler
    tokens = TB * S
    flops = int(tokens * LAYERS * (2 * HIDDEN * 3 * HIDDEN     # fused QKV proj
                                   + 2 * HIDDEN * HIDDEN       # output proj
                                   + 4 * HIDDEN * INTER        # FFN
                                   + 4 * S * HIDDEN))          # attention
    transcendentals = int(tokens * LAYERS * (NUM_HEADS * S + INTER))
    bytes_accessed = int(sum(a.size * a.dtype.itemsize
                             for a in (x2d, mask2d) + weight_args)
                         + TB * HIDDEN * 4)

    out = pl.pallas_call(
        kernel,
        out_shape=jax.ShapeDtypeStruct((TB, HIDDEN), jnp.float32),
        cost_estimate=pl.CostEstimate(
            flops=flops, transcendentals=transcendentals,
            bytes_accessed=bytes_accessed),
    )(x2d, mask2d, *weight_args)
    return out.reshape(T, B, HIDDEN)


def shared_biencoder_forward(params, q_ids, q_attn_mask, ctx_ids, ctx_attn_mask,
                             representation='cls'):
    # Shared encoder for both towers (same params), like SharedBiEncoder.forward.
    # When shapes match, both towers share a single kernel launch (tower axis
    # folded into the row dim), so the shared weights are DMA'd HBM->VMEM once.
    if q_ids.shape == ctx_ids.shape:
        ids = jnp.stack([q_ids, ctx_ids], axis=0)
        masks = jnp.stack([q_attn_mask, ctx_attn_mask], axis=0)
        out = encode_towers(ids, masks, params, representation)
        return out[0], out[1]
    q_out = encode_towers(q_ids[None], q_attn_mask[None], params, representation)[0]
    ctx_out = encode_towers(ctx_ids[None], ctx_attn_mask[None], params,
                            representation)[0]
    return q_out, ctx_out


# ---------------------------------- main ------------------------------------
if __name__ == "__main__":
    key = jax.random.PRNGKey(0)
    k_par, k_q, k_c = jax.random.split(key, 3)

    params = init_params(k_par)

    q_ids = jax.random.randint(k_q, (BATCH, SEQ), 0, VOCAB, dtype=jnp.int32)
    ctx_ids = jax.random.randint(k_c, (BATCH, SEQ), 0, VOCAB, dtype=jnp.int32)
    # attention masks: some rows have padding positions
    q_mask = jnp.array([[1] * SEQ, [1] * (SEQ - 2) + [0, 0]], dtype=jnp.int32)
    ctx_mask = jnp.array([[1] * (SEQ - 1) + [0], [1] * SEQ], dtype=jnp.int32)

    # module default: representation='cls'
    q_out, ctx_out = shared_biencoder_forward(params, q_ids, q_mask, ctx_ids, ctx_mask,
                                              representation='cls')
    jax.block_until_ready((q_out, ctx_out))
    assert q_out.shape == (BATCH, HIDDEN) and ctx_out.shape == (BATCH, HIDDEN)
    assert bool(jnp.all(jnp.isfinite(q_out))) and bool(jnp.all(jnp.isfinite(ctx_out)))

    # also exercise the 'mean' pooling branch (L2-normalized output)
    q_out_m, ctx_out_m = shared_biencoder_forward(params, q_ids, q_mask, ctx_ids,
                                                  ctx_mask, representation='mean')
    jax.block_until_ready((q_out_m, ctx_out_m))
    assert q_out_m.shape == (BATCH, HIDDEN) and ctx_out_m.shape == (BATCH, HIDDEN)
    norms = jnp.sqrt(jnp.sum(q_out_m * q_out_m, axis=-1))
    assert bool(jnp.all(jnp.abs(norms - 1.0) < 1e-2))

    print("KERNEL_OK")
</pallas_src>

<mosaic_0001>
module attributes {stable_mosaic.version = 11 : i64} {
  func.func @encoder_kernel(%arg0: memref<32x32xf32, #tpu.memory_space<vmem>>, %arg1: memref<4x8xf32, #tpu.memory_space<vmem>>, %arg2: memref<1x32xf32, #tpu.memory_space<vmem>>, %arg3: memref<1x32xf32, #tpu.memory_space<vmem>>, %arg4: memref<2x32x96xbf16, #tpu.memory_space<vmem>>, %arg5: memref<2x1x96xf32, #tpu.memory_space<vmem>>, %arg6: memref<2x32x32xbf16, #tpu.memory_space<vmem>>, %arg7: memref<2x1x32xf32, #tpu.memory_space<vmem>>, %arg8: memref<2x1x32xf32, #tpu.memory_space<vmem>>, %arg9: memref<2x1x32xf32, #tpu.memory_space<vmem>>, %arg10: memref<2x32x64xbf16, #tpu.memory_space<vmem>>, %arg11: memref<2x1x64xf32, #tpu.memory_space<vmem>>, %arg12: memref<2x64x32xbf16, #tpu.memory_space<vmem>>, %arg13: memref<2x1x32xf32, #tpu.memory_space<vmem>>, %arg14: memref<2x1x32xf32, #tpu.memory_space<vmem>>, %arg15: memref<2x1x32xf32, #tpu.memory_space<vmem>>, %arg16: memref<4x32xf32, #tpu.memory_space<vmem>>) attributes {dimension_semantics = [], scalar_prefetch = 0 : i64, scratch_operands = 0 : i64, tpu.core_type = #tpu.core_type<tc>} {
    %c0 = arith.constant 0 : index
    %c0_0 = arith.constant 0 : index
    %0 = vector.load %arg1[%c0, %c0_0] : memref<4x8xf32, #tpu.memory_space<vmem>>, vector<4x8xf32>
    %c0_1 = arith.constant 0 : index
    %c0_2 = arith.constant 0 : index
    %1 = vector.load %arg0[%c0_1, %c0_2] : memref<32x32xf32, #tpu.memory_space<vmem>>, vector<32x32xf32>
    %c0_3 = arith.constant 0 : index
    %c0_4 = arith.constant 0 : index
    %2 = vector.load %arg2[%c0_3, %c0_4] : memref<1x32xf32, #tpu.memory_space<vmem>>, vector<1x32xf32>
    %c0_5 = arith.constant 0 : index
    %c0_6 = arith.constant 0 : index
    %3 = vector.load %arg3[%c0_5, %c0_6] : memref<1x32xf32, #tpu.memory_space<vmem>>, vector<1x32xf32>
    %cst = arith.constant dense<0.000000e+00> : vector<32xf32>
    %4 = vector.multi_reduction <add>, %1, %cst [1] : vector<32x32xf32> to vector<32xf32>
    %5 = vector.shape_cast %4 : vector<32xf32> to vector<32x1xf32>
    %cst_7 = arith.constant 3.200000e+01 : f32
    %6 = vector.broadcast %cst_7 : f32 to vector<32x1xf32>
    %7 = arith.divf %5, %6 : vector<32x1xf32>
    %8 = vector.broadcast %7 : vector<32x1xf32> to vector<32x32xf32>
    %9 = arith.subf %1, %8 : vector<32x32xf32>
    %10 = arith.mulf %9, %9 : vector<32x32xf32>
    %cst_8 = arith.constant dense<0.000000e+00> : vector<32xf32>
    %11 = vector.multi_reduction <add>, %10, %cst_8 [1] : vector<32x32xf32> to vector<32xf32>
    %12 = vector.shape_cast %11 : vector<32xf32> to vector<32x1xf32>
    %cst_9 = arith.constant 3.200000e+01 : f32
    %13 = vector.broadcast %cst_9 : f32 to vector<32x1xf32>
    %14 = arith.divf %12, %13 : vector<32x1xf32>
    %15 = vector.broadcast %7 : vector<32x1xf32> to vector<32x32xf32>
    %16 = arith.subf %1, %15 : vector<32x32xf32>
    %cst_10 = arith.constant 9.99999996E-13 : f32
    %17 = vector.broadcast %cst_10 : f32 to vector<32x1xf32>
    %18 = arith.addf %14, %17 : vector<32x1xf32>
    %19 = math.rsqrt %18 : vector<32x1xf32>
    %20 = vector.broadcast %19 : vector<32x1xf32> to vector<32x32xf32>
    %21 = arith.mulf %16, %20 : vector<32x32xf32>
    %22 = vector.broadcast %2 : vector<1x32xf32> to vector<32x32xf32>
    %23 = arith.mulf %21, %22 : vector<32x32xf32>
    %24 = vector.broadcast %3 : vector<1x32xf32> to vector<32x32xf32>
    %25 = arith.addf %23, %24 : vector<32x32xf32>
    %cst_11 = arith.constant 1.000000e+00 : f32
    %26 = vector.broadcast %cst_11 : f32 to vector<4x8xf32>
    %27 = arith.subf %26, %0 : vector<4x8xf32>
    %cst_12 = arith.constant -1.000000e+09 : f32
    %28 = vector.broadcast %cst_12 : f32 to vector<4x8xf32>
    %29 = arith.mulf %27, %28 : vector<4x8xf32>
    %30 = vector.shape_cast %29 : vector<4x8xf32> to vector<4x1x8xf32>
    %31 = tpu.concatenate %30, %30 in 0 : vector<4x1x8xf32>, vector<4x1x8xf32> -> vector<8x1x8xf32>
    %32 = arith.truncf %25 : vector<32x32xf32> to vector<32x32xbf16>
    %c0_13 = arith.constant 0 : index
    %c0_14 = arith.constant 0 : index
    %c0_15 = arith.constant 0 : index
    %33 = vector.load %arg4[%c0_13, %c0_14, %c0_15] : memref<2x32x96xbf16, #tpu.memory_space<vmem>>, vector<1x32x96xbf16>
    %34 = vector.shape_cast %33 : vector<1x32x96xbf16> to vector<32x96xbf16>
    %cst_16 = arith.constant dense<0.000000e+00> : vector<32x96xf32>
    %35 = tpu.matmul %32, %34, %cst_16 {dimension_numbers = #tpu.dot_dimension_numbers<[1], [0], [0], [1], [0, 0, 1, 1], [], []>} : vector<32x32xbf16>, vector<32x96xbf16>, vector<32x96xf32> -> vector<32x96xf32>
    %c0_17 = arith.constant 0 : index
    %c0_18 = arith.constant 0 : index
    %c0_19 = arith.constant 0 : index
    %36 = vector.load %arg5[%c0_17, %c0_18, %c0_19] : memref<2x1x96xf32, #tpu.memory_space<vmem>>, vector<1x1x96xf32>
    %37 = vector.shape_cast %36 : vector<1x1x96xf32> to vector<1x96xf32>
    %38 = vector.broadcast %37 : vector<1x96xf32> to vector<32x96xf32>
    %39 = arith.addf %35, %38 : vector<32x96xf32>
    %40 = vector.extract_strided_slice %39 {offsets = [0, 0], sizes = [32, 16], strides = [1, 1]} : vector<32x96xf32> to vector<32x16xf32>
    %41 = vector.shape_cast %40 : vector<32x16xf32> to vector<4x8x16xf32>
    %42 = vector.extract_strided_slice %39 {offsets = [0, 16], sizes = [32, 16], strides = [1, 1]} : vector<32x96xf32> to vector<32x16xf32>
    %43 = vector.shape_cast %42 : vector<32x16xf32> to vector<4x8x16xf32>
    %44 = tpu.concatenate %41, %43 in 0 : vector<4x8x16xf32>, vector<4x8x16xf32> -> vector<8x8x16xf32>
    %45 = arith.truncf %44 : vector<8x8x16xf32> to vector<8x8x16xbf16>
    %46 = vector.extract_strided_slice %39 {offsets = [0, 32], sizes = [32, 16], strides = [1, 1]} : vector<32x96xf32> to vector<32x16xf32>
    %47 = vector.shape_cast %46 : vector<32x16xf32> to vector<4x8x16xf32>
    %48 = vector.extract_strided_slice %39 {offsets = [0, 48], sizes = [32, 16], strides = [1, 1]} : vector<32x96xf32> to vector<32x16xf32>
    %49 = vector.shape_cast %48 : vector<32x16xf32> to vector<4x8x16xf32>
    %50 = tpu.concatenate %47, %49 in 0 : vector<4x8x16xf32>, vector<4x8x16xf32> -> vector<8x8x16xf32>
    %51 = arith.truncf %50 : vector<8x8x16xf32> to vector<8x8x16xbf16>
    %52 = vector.extract_strided_slice %39 {offsets = [0, 64], sizes = [32, 16], strides = [1, 1]} : vector<32x96xf32> to vector<32x16xf32>
    %53 = vector.shape_cast %52 : vector<32x16xf32> to vector<4x8x16xf32>
    %54 = vector.extract_strided_slice %39 {offsets = [0, 80], sizes = [32, 16], strides = [1, 1]} : vector<32x96xf32> to vector<32x16xf32>
    %55 = vector.shape_cast %54 : vector<32x16xf32> to vector<4x8x16xf32>
    %56 = tpu.concatenate %53, %55 in 0 : vector<4x8x16xf32>, vector<4x8x16xf32> -> vector<8x8x16xf32>
    %57 = arith.truncf %56 : vector<8x8x16xf32> to vector<8x8x16xbf16>
    "tpu.trace_start"() <{level = 10 : i32, message = "bqd,bkd->bqk"}> : () -> ()
    %cst_20 = arith.constant dense<0.000000e+00> : vector<8x8x8xf32>
    %58 = tpu.matmul %45, %51, %cst_20 {dimension_numbers = #tpu.dot_dimension_numbers<[2], [2], [1], [1], [0, 0, 0, 1, 1, 1], [0], [0]>} : vector<8x8x16xbf16>, vector<8x8x16xbf16>, vector<8x8x8xf32> -> vector<8x8x8xf32>
    "tpu.trace_stop"() : () -> ()
    %59 = vector.broadcast %31 : vector<8x1x8xf32> to vector<8x8x8xf32>
    %60 = arith.addf %58, %59 : vector<8x8x8xf32>
    %cst_21 = arith.constant dense<0xFF800000> : vector<8x8xf32>
    %61 = vector.multi_reduction <maximumf>, %60, %cst_21 [2] : vector<8x8x8xf32> to vector<8x8xf32>
    %62 = vector.shape_cast %61 : vector<8x8xf32> to vector<8x8x1xf32>
    %63 = vector.broadcast %62 : vector<8x8x1xf32> to vector<8x8x8xf32>
    %64 = arith.subf %60, %63 : vector<8x8x8xf32>
    %65 = math.exp %64 : vector<8x8x8xf32>
    %cst_22 = arith.constant dense<0.000000e+00> : vector<8x8xf32>
    %66 = vector.multi_reduction <add>, %65, %cst_22 [2] : vector<8x8x8xf32> to vector<8x8xf32>
    %67 = vector.shape_cast %66 : vector<8x8xf32> to vector<8x8x1xf32>
    %68 = tpu.reciprocal %67 {approx = true} : vector<8x8x1xf32> -> vector<8x8x1xf32>
    %69 = vector.broadcast %68 : vector<8x8x1xf32> to vector<8x8x8xf32>
    %70 = arith.mulf %65, %69 : vector<8x8x8xf32>
    %71 = arith.truncf %70 : vector<8x8x8xf32> to vector<8x8x8xbf16>
    "tpu.trace_start"() <{level = 10 : i32, message = "bqk,bkd->bqd"}> : () -> ()
    %cst_23 = arith.constant dense<0.000000e+00> : vector<8x8x16xf32>
    %72 = tpu.matmul %71, %57, %cst_23 {dimension_numbers = #tpu.dot_dimension_numbers<[2], [1], [1], [2], [0, 0, 0, 1, 1, 2], [0], [0]>} : vector<8x8x8xbf16>, vector<8x8x16xbf16>, vector<8x8x16xf32> -> vector<8x8x16xf32>
    "tpu.trace_stop"() : () -> ()
    %73 = vector.extract_strided_slice %72 {offsets = [0, 0, 0], sizes = [4, 8, 16], strides = [1, 1, 1]} : vector<8x8x16xf32> to vector<4x8x16xf32>
    %74 = vector.shape_cast %73 : vector<4x8x16xf32> to vector<32x16xf32>
    %75 = vector.extract_strided_slice %72 {offsets = [4, 0, 0], sizes = [4, 8, 16], strides = [1, 1, 1]} : vector<8x8x16xf32> to vector<4x8x16xf32>
    %76 = vector.shape_cast %75 : vector<4x8x16xf32> to vector<32x16xf32>
    %77 = tpu.concatenate %74, %76 in 1 : vector<32x16xf32>, vector<32x16xf32> -> vector<32x32xf32>
    %78 = arith.truncf %77 : vector<32x32xf32> to vector<32x32xbf16>
    %c0_24 = arith.constant 0 : index
    %c0_25 = arith.constant 0 : index
    %c0_26 = arith.constant 0 : index
    %79 = vector.load %arg6[%c0_24, %c0_25, %c0_26] : memref<2x32x32xbf16, #tpu.memory_space<vmem>>, vector<1x32x32xbf16>
    %80 = vector.shape_cast %79 : vector<1x32x32xbf16> to vector<32x32xbf16>
    %cst_27 = arith.constant dense<0.000000e+00> : vector<32x32xf32>
    %81 = tpu.matmul %78, %80, %cst_27 {dimension_numbers = #tpu.dot_dimension_numbers<[1], [0], [0], [1], [0, 0, 1, 1], [], []>} : vector<32x32xbf16>, vector<32x32xbf16>, vector<32x32xf32> -> vector<32x32xf32>
    %c0_28 = arith.constant 0 : index
    %c0_29 = arith.constant 0 : index
    %c0_30 = arith.constant 0 : index
    %82 = vector.load %arg7[%c0_28, %c0_29, %c0_30] : memref<2x1x32xf32, #tpu.memory_space<vmem>>, vector<1x1x32xf32>
    %83 = vector.shape_cast %82 : vector<1x1x32xf32> to vector<1x32xf32>
    %84 = vector.broadcast %83 : vector<1x32xf32> to vector<32x32xf32>
    %85 = arith.addf %81, %84 : vector<32x32xf32>
    %86 = arith.addf %25, %85 : vector<32x32xf32>
    %c0_31 = arith.constant 0 : index
    %c0_32 = arith.constant 0 : index
    %c0_33 = arith.constant 0 : index
    %87 = vector.load %arg8[%c0_31, %c0_32, %c0_33] : memref<2x1x32xf32, #tpu.memory_space<vmem>>, vector<1x1x32xf32>
    %88 = vector.shape_cast %87 : vector<1x1x32xf32> to vector<1x32xf32>
    %c0_34 = arith.constant 0 : index
    %c0_35 = arith.constant 0 : index
    %c0_36 = arith.constant 0 : index
    %89 = vector.load %arg9[%c0_34, %c0_35, %c0_36] : memref<2x1x32xf32, #tpu.memory_space<vmem>>, vector<1x1x32xf32>
    %90 = vector.shape_cast %89 : vector<1x1x32xf32> to vector<1x32xf32>
    %cst_37 = arith.constant dense<0.000000e+00> : vector<32xf32>
    %91 = vector.multi_reduction <add>, %86, %cst_37 [1] : vector<32x32xf32> to vector<32xf32>
    %92 = vector.shape_cast %91 : vector<32xf32> to vector<32x1xf32>
    %cst_38 = arith.constant 3.200000e+01 : f32
    %93 = vector.broadcast %cst_38 : f32 to vector<32x1xf32>
    %94 = arith.divf %92, %93 : vector<32x1xf32>
    %95 = vector.broadcast %94 : vector<32x1xf32> to vector<32x32xf32>
    %96 = arith.subf %86, %95 : vector<32x32xf32>
    %97 = arith.mulf %96, %96 : vector<32x32xf32>
    %cst_39 = arith.constant dense<0.000000e+00> : vector<32xf32>
    %98 = vector.multi_reduction <add>, %97, %cst_39 [1] : vector<32x32xf32> to vector<32xf32>
    %99 = vector.shape_cast %98 : vector<32xf32> to vector<32x1xf32>
    %cst_40 = arith.constant 3.200000e+01 : f32
    %100 = vector.broadcast %cst_40 : f32 to vector<32x1xf32>
    %101 = arith.divf %99, %100 : vector<32x1xf32>
    %102 = vector.broadcast %94 : vector<32x1xf32> to vector<32x32xf32>
    %103 = arith.subf %86, %102 : vector<32x32xf32>
    %cst_41 = arith.constant 9.99999996E-13 : f32
    %104 = vector.broadcast %cst_41 : f32 to vector<32x1xf32>
    %105 = arith.addf %101, %104 : vector<32x1xf32>
    %106 = math.rsqrt %105 : vector<32x1xf32>
    %107 = vector.broadcast %106 : vector<32x1xf32> to vector<32x32xf32>
    %108 = arith.mulf %103, %107 : vector<32x32xf32>
    %109 = vector.broadcast %88 : vector<1x32xf32> to vector<32x32xf32>
    %110 = arith.mulf %108, %109 : vector<32x32xf32>
    %111 = vector.broadcast %90 : vector<1x32xf32> to vector<32x32xf32>
    %112 = arith.addf %110, %111 : vector<32x32xf32>
    %113 = arith.truncf %112 : vector<32x32xf32> to vector<32x32xbf16>
    %c0_42 = arith.constant 0 : index
    %c0_43 = arith.constant 0 : index
    %c0_44 = arith.constant 0 : index
    %114 = vector.load %arg10[%c0_42, %c0_43, %c0_44] : memref<2x32x64xbf16, #tpu.memory_space<vmem>>, vector<1x32x64xbf16>
    %115 = vector.shape_cast %114 : vector<1x32x64xbf16> to vector<32x64xbf16>
    %cst_45 = arith.constant dense<0.000000e+00> : vector<32x64xf32>
    %116 = tpu.matmul %113, %115, %cst_45 {dimension_numbers = #tpu.dot_dimension_numbers<[1], [0], [0], [1], [0, 0, 1, 1], [], []>} : vector<32x32xbf16>, vector<32x64xbf16>, vector<32x64xf32> -> vector<32x64xf32>
    %c0_46 = arith.constant 0 : index
    %c0_47 = arith.constant 0 : index
    %c0_48 = arith.constant 0 : index
    %117 = vector.load %arg11[%c0_46, %c0_47, %c0_48] : memref<2x1x64xf32, #tpu.memory_space<vmem>>, vector<1x1x64xf32>
    %118 = vector.shape_cast %117 : vector<1x1x64xf32> to vector<1x64xf32>
    %119 = vector.broadcast %118 : vector<1x64xf32> to vector<32x64xf32>
    %120 = arith.addf %116, %119 : vector<32x64xf32>
    %cst_49 = arith.constant 5.000000e-01 : f32
    %121 = vector.broadcast %cst_49 : f32 to vector<32x64xf32>
    %122 = arith.mulf %121, %120 : vector<32x64xf32>
    %cst_50 = arith.constant 4.471500e-02 : f32
    %123 = vector.broadcast %cst_50 : f32 to vector<32x64xf32>
    %124 = arith.mulf %123, %120 : vector<32x64xf32>
    %125 = arith.mulf %124, %120 : vector<32x64xf32>
    %126 = arith.mulf %125, %120 : vector<32x64xf32>
    %127 = arith.addf %120, %126 : vector<32x64xf32>
    %cst_51 = arith.constant 0.797884583 : f32
    %128 = vector.broadcast %cst_51 : f32 to vector<32x64xf32>
    %129 = arith.mulf %128, %127 : vector<32x64xf32>
    %130 = math.tanh %129 : vector<32x64xf32>
    %cst_52 = arith.constant 1.000000e+00 : f32
    %131 = vector.broadcast %cst_52 : f32 to vector<32x64xf32>
    %132 = arith.addf %131, %130 : vector<32x64xf32>
    %133 = arith.mulf %122, %132 : vector<32x64xf32>
    %134 = arith.truncf %133 : vector<32x64xf32> to vector<32x64xbf16>
    %c0_53 = arith.constant 0 : index
    %c0_54 = arith.constant 0 : index
    %c0_55 = arith.constant 0 : index
    %135 = vector.load %arg12[%c0_53, %c0_54, %c0_55] : memref<2x64x32xbf16, #tpu.memory_space<vmem>>, vector<1x64x32xbf16>
    %136 = vector.shape_cast %135 : vector<1x64x32xbf16> to vector<64x32xbf16>
    %cst_56 = arith.constant dense<0.000000e+00> : vector<32x32xf32>
    %137 = tpu.matmul %134, %136, %cst_56 {dimension_numbers = #tpu.dot_dimension_numbers<[1], [0], [0], [1], [0, 0, 1, 1], [], []>} : vector<32x64xbf16>, vector<64x32xbf16>, vector<32x32xf32> -> vector<32x32xf32>
    %c0_57 = arith.constant 0 : index
    %c0_58 = arith.constant 0 : index
    %c0_59 = arith.constant 0 : index
    %138 = vector.load %arg13[%c0_57, %c0_58, %c0_59] : memref<2x1x32xf32, #tpu.memory_space<vmem>>, vector<1x1x32xf32>
    %139 = vector.shape_cast %138 : vector<1x1x32xf32> to vector<1x32xf32>
    %140 = vector.broadcast %139 : vector<1x32xf32> to vector<32x32xf32>
    %141 = arith.addf %137, %140 : vector<32x32xf32>
    %142 = arith.addf %112, %141 : vector<32x32xf32>
    %c0_60 = arith.constant 0 : index
    %c0_61 = arith.constant 0 : index
    %c0_62 = arith.constant 0 : index
    %143 = vector.load %arg14[%c0_60, %c0_61, %c0_62] : memref<2x1x32xf32, #tpu.memory_space<vmem>>, vector<1x1x32xf32>
    %144 = vector.shape_cast %143 : vector<1x1x32xf32> to vector<1x32xf32>
    %c0_63 = arith.constant 0 : index
    %c0_64 = arith.constant 0 : index
    %c0_65 = arith.constant 0 : index
    %145 = vector.load %arg15[%c0_63, %c0_64, %c0_65] : memref<2x1x32xf32, #tpu.memory_space<vmem>>, vector<1x1x32xf32>
    %146 = vector.shape_cast %145 : vector<1x1x32xf32> to vector<1x32xf32>
    %cst_66 = arith.constant dense<0.000000e+00> : vector<32xf32>
    %147 = vector.multi_reduction <add>, %142, %cst_66 [1] : vector<32x32xf32> to vector<32xf32>
    %148 = vector.shape_cast %147 : vector<32xf32> to vector<32x1xf32>
    %cst_67 = arith.constant 3.200000e+01 : f32
    %149 = vector.broadcast %cst_67 : f32 to vector<32x1xf32>
    %150 = arith.divf %148, %149 : vector<32x1xf32>
    %151 = vector.broadcast %150 : vector<32x1xf32> to vector<32x32xf32>
    %152 = arith.subf %142, %151 : vector<32x32xf32>
    %153 = arith.mulf %152, %152 : vector<32x32xf32>
    %cst_68 = arith.constant dense<0.000000e+00> : vector<32xf32>
    %154 = vector.multi_reduction <add>, %153, %cst_68 [1] : vector<32x32xf32> to vector<32xf32>
    %155 = vector.shape_cast %154 : vector<32xf32> to vector<32x1xf32>
    %cst_69 = arith.constant 3.200000e+01 : f32
    %156 = vector.broadcast %cst_69 : f32 to vector<32x1xf32>
    %157 = arith.divf %155, %156 : vector<32x1xf32>
    %158 = vector.broadcast %150 : vector<32x1xf32> to vector<32x32xf32>
    %159 = arith.subf %142, %158 : vector<32x32xf32>
    %cst_70 = arith.constant 9.99999996E-13 : f32
    %160 = vector.broadcast %cst_70 : f32 to vector<32x1xf32>
    %161 = arith.addf %157, %160 : vector<32x1xf32>
    %162 = math.rsqrt %161 : vector<32x1xf32>
    %163 = vector.broadcast %162 : vector<32x1xf32> to vector<32x32xf32>
    %164 = arith.mulf %159, %163 : vector<32x32xf32>
    %165 = vector.broadcast %144 : vector<1x32xf32> to vector<32x32xf32>
    %166 = arith.mulf %164, %165 : vector<32x32xf32>
    %167 = vector.broadcast %146 : vector<1x32xf32> to vector<32x32xf32>
    %168 = arith.addf %166, %167 : vector<32x32xf32>
    %169 = arith.truncf %168 : vector<32x32xf32> to vector<32x32xbf16>
    %c1 = arith.constant 1 : index
    %c0_71 = arith.constant 0 : index
    %c0_72 = arith.constant 0 : index
    %170 = vector.load %arg4[%c1, %c0_71, %c0_72] : memref<2x32x96xbf16, #tpu.memory_space<vmem>>, vector<1x32x96xbf16>
    %171 = vector.shape_cast %170 : vector<1x32x96xbf16> to vector<32x96xbf16>
    %cst_73 = arith.constant dense<0.000000e+00> : vector<32x96xf32>
    %172 = tpu.matmul %169, %171, %cst_73 {dimension_numbers = #tpu.dot_dimension_numbers<[1], [0], [0], [1], [0, 0, 1, 1], [], []>} : vector<32x32xbf16>, vector<32x96xbf16>, vector<32x96xf32> -> vector<32x96xf32>
    %c1_74 = arith.constant 1 : index
    %c0_75 = arith.constant 0 : index
    %c0_76 = arith.constant 0 : index
    %173 = vector.load %arg5[%c1_74, %c0_75, %c0_76] : memref<2x1x96xf32, #tpu.memory_space<vmem>>, vector<1x1x96xf32>
    %174 = vector.shape_cast %173 : vector<1x1x96xf32> to vector<1x96xf32>
    %175 = vector.broadcast %174 : vector<1x96xf32> to vector<32x96xf32>
    %176 = arith.addf %172, %175 : vector<32x96xf32>
    %177 = vector.extract_strided_slice %176 {offsets = [0, 0], sizes = [32, 16], strides = [1, 1]} : vector<32x96xf32> to vector<32x16xf32>
    %178 = vector.shape_cast %177 : vector<32x16xf32> to vector<4x8x16xf32>
    %179 = vector.extract_strided_slice %176 {offsets = [0, 16], sizes = [32, 16], strides = [1, 1]} : vector<32x96xf32> to vector<32x16xf32>
    %180 = vector.shape_cast %179 : vector<32x16xf32> to vector<4x8x16xf32>
    %181 = tpu.concatenate %178, %180 in 0 : vector<4x8x16xf32>, vector<4x8x16xf32> -> vector<8x8x16xf32>
    %182 = arith.truncf %181 : vector<8x8x16xf32> to vector<8x8x16xbf16>
    %183 = vector.extract_strided_slice %176 {offsets = [0, 32], sizes = [32, 16], strides = [1, 1]} : vector<32x96xf32> to vector<32x16xf32>
    %184 = vector.shape_cast %183 : vector<32x16xf32> to vector<4x8x16xf32>
    %185 = vector.extract_strided_slice %176 {offsets = [0, 48], sizes = [32, 16], strides = [1, 1]} : vector<32x96xf32> to vector<32x16xf32>
    %186 = vector.shape_cast %185 : vector<32x16xf32> to vector<4x8x16xf32>
    %187 = tpu.concatenate %184, %186 in 0 : vector<4x8x16xf32>, vector<4x8x16xf32> -> vector<8x8x16xf32>
    %188 = arith.truncf %187 : vector<8x8x16xf32> to vector<8x8x16xbf16>
    %189 = vector.extract_strided_slice %176 {offsets = [0, 64], sizes = [32, 16], strides = [1, 1]} : vector<32x96xf32> to vector<32x16xf32>
    %190 = vector.shape_cast %189 : vector<32x16xf32> to vector<4x8x16xf32>
    %191 = vector.extract_strided_slice %176 {offsets = [0, 80], sizes = [32, 16], strides = [1, 1]} : vector<32x96xf32> to vector<32x16xf32>
    %192 = vector.shape_cast %191 : vector<32x16xf32> to vector<4x8x16xf32>
    %193 = tpu.concatenate %190, %192 in 0 : vector<4x8x16xf32>, vector<4x8x16xf32> -> vector<8x8x16xf32>
    %194 = arith.truncf %193 : vector<8x8x16xf32> to vector<8x8x16xbf16>
    "tpu.trace_start"() <{level = 10 : i32, message = "bqd,bkd->bqk"}> : () -> ()
    %cst_77 = arith.constant dense<0.000000e+00> : vector<8x8x8xf32>
    %195 = tpu.matmul %182, %188, %cst_77 {dimension_numbers = #tpu.dot_dimension_numbers<[2], [2], [1], [1], [0, 0, 0, 1, 1, 1], [0], [0]>} : vector<8x8x16xbf16>, vector<8x8x16xbf16>, vector<8x8x8xf32> -> vector<8x8x8xf32>
    "tpu.trace_stop"() : () -> ()
    %196 = vector.broadcast %31 : vector<8x1x8xf32> to vector<8x8x8xf32>
    %197 = arith.addf %195, %196 : vector<8x8x8xf32>
    %cst_78 = arith.constant dense<0xFF800000> : vector<8x8xf32>
    %198 = vector.multi_reduction <maximumf>, %197, %cst_78 [2] : vector<8x8x8xf32> to vector<8x8xf32>
    %199 = vector.shape_cast %198 : vector<8x8xf32> to vector<8x8x1xf32>
    %200 = vector.broadcast %199 : vector<8x8x1xf32> to vector<8x8x8xf32>
    %201 = arith.subf %197, %200 : vector<8x8x8xf32>
    %202 = math.exp %201 : vector<8x8x8xf32>
    %cst_79 = arith.constant dense<0.000000e+00> : vector<8x8xf32>
    %203 = vector.multi_reduction <add>, %202, %cst_79 [2] : vector<8x8x8xf32> to vector<8x8xf32>
    %204 = vector.shape_cast %203 : vector<8x8xf32> to vector<8x8x1xf32>
    %205 = tpu.reciprocal %204 {approx = true} : vector<8x8x1xf32> -> vector<8x8x1xf32>
    %206 = vector.broadcast %205 : vector<8x8x1xf32> to vector<8x8x8xf32>
    %207 = arith.mulf %202, %206 : vector<8x8x8xf32>
    %208 = arith.truncf %207 : vector<8x8x8xf32> to vector<8x8x8xbf16>
    "tpu.trace_start"() <{level = 10 : i32, message = "bqk,bkd->bqd"}> : () -> ()
    %cst_80 = arith.constant dense<0.000000e+00> : vector<8x8x16xf32>
    %209 = tpu.matmul %208, %194, %cst_80 {dimension_numbers = #tpu.dot_dimension_numbers<[2], [1], [1], [2], [0, 0, 0, 1, 1, 2], [0], [0]>} : vector<8x8x8xbf16>, vector<8x8x16xbf16>, vector<8x8x16xf32> -> vector<8x8x16xf32>
    "tpu.trace_stop"() : () -> ()
    %210 = vector.extract_strided_slice %209 {offsets = [0, 0, 0], sizes = [4, 8, 16], strides = [1, 1, 1]} : vector<8x8x16xf32> to vector<4x8x16xf32>
    %211 = vector.shape_cast %210 : vector<4x8x16xf32> to vector<32x16xf32>
    %212 = vector.extract_strided_slice %209 {offsets = [4, 0, 0], sizes = [4, 8, 16], strides = [1, 1, 1]} : vector<8x8x16xf32> to vector<4x8x16xf32>
    %213 = vector.shape_cast %212 : vector<4x8x16xf32> to vector<32x16xf32>
    %214 = tpu.concatenate %211, %213 in 1 : vector<32x16xf32>, vector<32x16xf32> -> vector<32x32xf32>
    %215 = arith.truncf %214 : vector<32x32xf32> to vector<32x32xbf16>
    %c1_81 = arith.constant 1 : index
    %c0_82 = arith.constant 0 : index
    %c0_83 = arith.constant 0 : index
    %216 = vector.load %arg6[%c1_81, %c0_82, %c0_83] : memref<2x32x32xbf16, #tpu.memory_space<vmem>>, vector<1x32x32xbf16>
    %217 = vector.shape_cast %216 : vector<1x32x32xbf16> to vector<32x32xbf16>
    %cst_84 = arith.constant dense<0.000000e+00> : vector<32x32xf32>
    %218 = tpu.matmul %215, %217, %cst_84 {dimension_numbers = #tpu.dot_dimension_numbers<[1], [0], [0], [1], [0, 0, 1, 1], [], []>} : vector<32x32xbf16>, vector<32x32xbf16>, vector<32x32xf32> -> vector<32x32xf32>
    %c1_85 = arith.constant 1 : index
    %c0_86 = arith.constant 0 : index
    %c0_87 = arith.constant 0 : index
    %219 = vector.load %arg7[%c1_85, %c0_86, %c0_87] : memref<2x1x32xf32, #tpu.memory_space<vmem>>, vector<1x1x32xf32>
    %220 = vector.shape_cast %219 : vector<1x1x32xf32> to vector<1x32xf32>
    %221 = vector.broadcast %220 : vector<1x32xf32> to vector<32x32xf32>
    %222 = arith.addf %218, %221 : vector<32x32xf32>
    %223 = arith.addf %168, %222 : vector<32x32xf32>
    %c1_88 = arith.constant 1 : index
    %c0_89 = arith.constant 0 : index
    %c0_90 = arith.constant 0 : index
    %224 = vector.load %arg8[%c1_88, %c0_89, %c0_90] : memref<2x1x32xf32, #tpu.memory_space<vmem>>, vector<1x1x32xf32>
    %225 = vector.shape_cast %224 : vector<1x1x32xf32> to vector<1x32xf32>
    %c1_91 = arith.constant 1 : index
    %c0_92 = arith.constant 0 : index
    %c0_93 = arith.constant 0 : index
    %226 = vector.load %arg9[%c1_91, %c0_92, %c0_93] : memref<2x1x32xf32, #tpu.memory_space<vmem>>, vector<1x1x32xf32>
    %227 = vector.shape_cast %226 : vector<1x1x32xf32> to vector<1x32xf32>
    %cst_94 = arith.constant dense<0.000000e+00> : vector<32xf32>
    %228 = vector.multi_reduction <add>, %223, %cst_94 [1] : vector<32x32xf32> to vector<32xf32>
    %229 = vector.shape_cast %228 : vector<32xf32> to vector<32x1xf32>
    %cst_95 = arith.constant 3.200000e+01 : f32
    %230 = vector.broadcast %cst_95 : f32 to vector<32x1xf32>
    %231 = arith.divf %229, %230 : vector<32x1xf32>
    %232 = vector.broadcast %231 : vector<32x1xf32> to vector<32x32xf32>
    %233 = arith.subf %223, %232 : vector<32x32xf32>
    %234 = arith.mulf %233, %233 : vector<32x32xf32>
    %cst_96 = arith.constant dense<0.000000e+00> : vector<32xf32>
    %235 = vector.multi_reduction <add>, %234, %cst_96 [1] : vector<32x32xf32> to vector<32xf32>
    %236 = vector.shape_cast %235 : vector<32xf32> to vector<32x1xf32>
    %cst_97 = arith.constant 3.200000e+01 : f32
    %237 = vector.broadcast %cst_97 : f32 to vector<32x1xf32>
    %238 = arith.divf %236, %237 : vector<32x1xf32>
    %239 = vector.broadcast %231 : vector<32x1xf32> to vector<32x32xf32>
    %240 = arith.subf %223, %239 : vector<32x32xf32>
    %cst_98 = arith.constant 9.99999996E-13 : f32
    %241 = vector.broadcast %cst_98 : f32 to vector<32x1xf32>
    %242 = arith.addf %238, %241 : vector<32x1xf32>
    %243 = math.rsqrt %242 : vector<32x1xf32>
    %244 = vector.broadcast %243 : vector<32x1xf32> to vector<32x32xf32>
    %245 = arith.mulf %240, %244 : vector<32x32xf32>
    %246 = vector.broadcast %225 : vector<1x32xf32> to vector<32x32xf32>
    %247 = arith.mulf %245, %246 : vector<32x32xf32>
    %248 = vector.broadcast %227 : vector<1x32xf32> to vector<32x32xf32>
    %249 = arith.addf %247, %248 : vector<32x32xf32>
    %250 = arith.truncf %249 : vector<32x32xf32> to vector<32x32xbf16>
    %c1_99 = arith.constant 1 : index
    %c0_100 = arith.constant 0 : index
    %c0_101 = arith.constant 0 : index
    %251 = vector.load %arg10[%c1_99, %c0_100, %c0_101] : memref<2x32x64xbf16, #tpu.memory_space<vmem>>, vector<1x32x64xbf16>
    %252 = vector.shape_cast %251 : vector<1x32x64xbf16> to vector<32x64xbf16>
    %cst_102 = arith.constant dense<0.000000e+00> : vector<32x64xf32>
    %253 = tpu.matmul %250, %252, %cst_102 {dimension_numbers = #tpu.dot_dimension_numbers<[1], [0], [0], [1], [0, 0, 1, 1], [], []>} : vector<32x32xbf16>, vector<32x64xbf16>, vector<32x64xf32> -> vector<32x64xf32>
    %c1_103 = arith.constant 1 : index
    %c0_104 = arith.constant 0 : index
    %c0_105 = arith.constant 0 : index
    %254 = vector.load %arg11[%c1_103, %c0_104, %c0_105] : memref<2x1x64xf32, #tpu.memory_space<vmem>>, vector<1x1x64xf32>
    %255 = vector.shape_cast %254 : vector<1x1x64xf32> to vector<1x64xf32>
    %256 = vector.broadcast %255 : vector<1x64xf32> to vector<32x64xf32>
    %257 = arith.addf %253, %256 : vector<32x64xf32>
    %cst_106 = arith.constant 5.000000e-01 : f32
    %258 = vector.broadcast %cst_106 : f32 to vector<32x64xf32>
    %259 = arith.mulf %258, %257 : vector<32x64xf32>
    %cst_107 = arith.constant 4.471500e-02 : f32
    %260 = vector.broadcast %cst_107 : f32 to vector<32x64xf32>
    %261 = arith.mulf %260, %257 : vector<32x64xf32>
    %262 = arith.mulf %261, %257 : vector<32x64xf32>
    %263 = arith.mulf %262, %257 : vector<32x64xf32>
    %264 = arith.addf %257, %263 : vector<32x64xf32>
    %cst_108 = arith.constant 0.797884583 : f32
    %265 = vector.broadcast %cst_108 : f32 to vector<32x64xf32>
    %266 = arith.mulf %265, %264 : vector<32x64xf32>
    %267 = math.tanh %266 : vector<32x64xf32>
    %cst_109 = arith.constant 1.000000e+00 : f32
    %268 = vector.broadcast %cst_109 : f32 to vector<32x64xf32>
    %269 = arith.addf %268, %267 : vector<32x64xf32>
    %270 = arith.mulf %259, %269 : vector<32x64xf32>
    %271 = arith.truncf %270 : vector<32x64xf32> to vector<32x64xbf16>
    %c1_110 = arith.constant 1 : index
    %c0_111 = arith.constant 0 : index
    %c0_112 = arith.constant 0 : index
    %272 = vector.load %arg12[%c1_110, %c0_111, %c0_112] : memref<2x64x32xbf16, #tpu.memory_space<vmem>>, vector<1x64x32xbf16>
    %273 = vector.shape_cast %272 : vector<1x64x32xbf16> to vector<64x32xbf16>
    %cst_113 = arith.constant dense<0.000000e+00> : vector<32x32xf32>
    %274 = tpu.matmul %271, %273, %cst_113 {dimension_numbers = #tpu.dot_dimension_numbers<[1], [0], [0], [1], [0, 0, 1, 1], [], []>} : vector<32x64xbf16>, vector<64x32xbf16>, vector<32x32xf32> -> vector<32x32xf32>
    %c1_114 = arith.constant 1 : index
    %c0_115 = arith.constant 0 : index
    %c0_116 = arith.constant 0 : index
    %275 = vector.load %arg13[%c1_114, %c0_115, %c0_116] : memref<2x1x32xf32, #tpu.memory_space<vmem>>, vector<1x1x32xf32>
    %276 = vector.shape_cast %275 : vector<1x1x32xf32> to vector<1x32xf32>
    %277 = vector.broadcast %276 : vector<1x32xf32> to vector<32x32xf32>
    %278 = arith.addf %274, %277 : vector<32x32xf32>
    %279 = arith.addf %249, %278 : vector<32x32xf32>
    %c1_117 = arith.constant 1 : index
    %c0_118 = arith.constant 0 : index
    %c0_119 = arith.constant 0 : index
    %280 = vector.load %arg14[%c1_117, %c0_118, %c0_119] : memref<2x1x32xf32, #tpu.memory_space<vmem>>, vector<1x1x32xf32>
    %281 = vector.shape_cast %280 : vector<1x1x32xf32> to vector<1x32xf32>
    %c1_120 = arith.constant 1 : index
    %c0_121 = arith.constant 0 : index
    %c0_122 = arith.constant 0 : index
    %282 = vector.load %arg15[%c1_120, %c0_121, %c0_122] : memref<2x1x32xf32, #tpu.memory_space<vmem>>, vector<1x1x32xf32>
    %283 = vector.shape_cast %282 : vector<1x1x32xf32> to vector<1x32xf32>
    %cst_123 = arith.constant dense<0.000000e+00> : vector<32xf32>
    %284 = vector.multi_reduction <add>, %279, %cst_123 [1] : vector<32x32xf32> to vector<32xf32>
    %285 = vector.shape_cast %284 : vector<32xf32> to vector<32x1xf32>
    %cst_124 = arith.constant 3.200000e+01 : f32
    %286 = vector.broadcast %cst_124 : f32 to vector<32x1xf32>
    %287 = arith.divf %285, %286 : vector<32x1xf32>
    %288 = vector.broadcast %287 : vector<32x1xf32> to vector<32x32xf32>
    %289 = arith.subf %279, %288 : vector<32x32xf32>
    %290 = arith.mulf %289, %289 : vector<32x32xf32>
    %cst_125 = arith.constant dense<0.000000e+00> : vector<32xf32>
    %291 = vector.multi_reduction <add>, %290, %cst_125 [1] : vector<32x32xf32> to vector<32xf32>
    %292 = vector.shape_cast %291 : vector<32xf32> to vector<32x1xf32>
    %cst_126 = arith.constant 3.200000e+01 : f32
    %293 = vector.broadcast %cst_126 : f32 to vector<32x1xf32>
    %294 = arith.divf %292, %293 : vector<32x1xf32>
    %295 = vector.broadcast %287 : vector<32x1xf32> to vector<32x32xf32>
    %296 = arith.subf %279, %295 : vector<32x32xf32>
    %cst_127 = arith.constant 9.99999996E-13 : f32
    %297 = vector.broadcast %cst_127 : f32 to vector<32x1xf32>
    %298 = arith.addf %294, %297 : vector<32x1xf32>
    %299 = math.rsqrt %298 : vector<32x1xf32>
    %300 = vector.broadcast %299 : vector<32x1xf32> to vector<32x32xf32>
    %301 = arith.mulf %296, %300 : vector<32x32xf32>
    %302 = vector.broadcast %281 : vector<1x32xf32> to vector<32x32xf32>
    %303 = arith.mulf %301, %302 : vector<32x32xf32>
    %304 = vector.broadcast %283 : vector<1x32xf32> to vector<32x32xf32>
    %305 = arith.addf %303, %304 : vector<32x32xf32>
    %306 = vector.shape_cast %305 : vector<32x32xf32> to vector<4x8x32xf32>
    %307 = vector.extract_strided_slice %306 {offsets = [0, 0, 0], sizes = [4, 1, 32], strides = [1, 1, 1]} : vector<4x8x32xf32> to vector<4x1x32xf32>
    %308 = vector.shape_cast %307 : vector<4x1x32xf32> to vector<4x32xf32>
    %c0_128 = arith.constant 0 : index
    %c0_129 = arith.constant 0 : index
    %309 = vector.load %arg16[%c0_128, %c0_129] : memref<4x32xf32, #tpu.memory_space<vmem>>, vector<4x32xf32>
    tpu.vector_store %arg16[%c0_128, %c0_129], %308 {strides = array<i32>} : memref<4x32xf32, #tpu.memory_space<vmem>>, vector<4x32xf32>,
    return
  }
}

</mosaic_0001>

<bundles_post_ra>
// kernel: tpu_custom_call.1
= control target key start
LH: loop header
LB: loop body
LE: loop exit
PB: predicated region body
PF: predicated region fallthrough
CT: control target
= control target key end

     0   :  { %s4730_s0 = inlined_call_operand.vmem [shape: f32[32,32], index: 0, kind: input, shape index: {}]   ;;  %s4731_s1 = inlined_call_operand.hbm [shape: f32[4,8], index: 1, kind: input, shape index: {}]   ;;  %s4732_s2 = inlined_call_operand.vmem [shape: f32[1,32], index: 2, kind: input, shape index: {}]   ;;  %s4733_s3 = inlined_call_operand.hbm [shape: f32[1,32], index: 3, kind: input, shape index: {}]   ;;  %s4734_s4 = inlined_call_operand.vmem [shape: bf16[2,32,96], index: 4, kind: input, shape index: {}]   ;;  %s4735_s5 = inlined_call_operand.vmem [shape: f32[2,1,96], index: 5, kind: input, shape index: {}]   ;;  %s4736_s6 = inlined_call_operand.vmem [shape: bf16[2,32,32], index: 6, kind: input, shape index: {}]   ;;  %s4737_s7 = inlined_call_operand.vmem [shape: f32[2,1,32], index: 7, kind: input, shape index: {}]   ;;  %s4738_s8 = inlined_call_operand.vmem [shape: f32[2,1,32], index: 8, kind: input, shape index: {}]   ;;  %s4739_s9 = inlined_call_operand.vmem [shape: f32[2,1,32], index: 9, kind: input, shape index: {}]   ;;  %s4740_s10 = inlined_call_operand.hbm [shape: bf16[2,32,64], index: 10, kind: input, shape index: {}]   ;;  %s4741_s11 = inlined_call_operand.vmem [shape: f32[2,1,64], index: 11, kind: input, shape index: {}]   ;;  %s4742_s12 = inlined_call_operand.vmem [shape: bf16[2,64,32], index: 12, kind: input, shape index: {}]   ;;  %s4743_s13 = inlined_call_operand.vmem [shape: f32[2,1,32], index: 13, kind: input, shape index: {}]   ;;  %s4744_s14 = inlined_call_operand.vmem [shape: f32[2,1,32], index: 14, kind: input, shape index: {}]   ;;  %s4745_s15 = inlined_call_operand.vmem [shape: f32[2,1,32], index: 15, kind: input, shape index: {}]   ;;  %s4746_s16 = inlined_call_operand.hbm [shape: f32[4,32], index: 16, kind: output, shape index: {}]  }
   0x1   :  { %4748 = sst [smem:[#allocation12_spill]] %s4730_s0 }
   0x2   :  { %21 = vsyncpa [#allocation3], 0 }
   0x3   :  { %22 = vsyncpa [#allocation6], 0 }
   0x4   :  { %23 = vsyncpa [#allocation4], 0  ;;  %s3916_s21 = smov [#allocation5]   ;;  %s3917_s23 = smov [#allocation2]  }
   0x5   :  { %s44_s22 = sshll.u32 %s3916_s21, 4  ;;  %s32_s24 = sshll.u32 %s3917_s23, 4  ;;  %s45_s22 = int_to_ptr.vmem [resolvable:$true] %s44_s22  ;;  %s33_s24 = int_to_ptr.vmem [resolvable:$true] %s32_s24 }
   0x6   :  { %s3822_s27 = scalar_lea.hbm %s4733_s3, 16 }
   0x7   :  { %p3823_p0 = scmp.ne.s32.totalorder %s4733_s3, %s3822_s27  ;;  %p3826_p1 = scmp.lt.u32.totalorder %s3822_s27, %s4733_s3 }
   0x9   :  { %p3828_p2 = pnand %p3826_p1, %p3823_p0 }
   0xb   :  { %3831 = shalt.err (!%p3828_p2)
}
   0xc   :  { %s3832_s17 = scalar_lea.vmem %s45_s22, 16  ;;  %s3836_s18 = scalar_lea.vmem %s45_s22, 32 }
   0xd   :  { %p3833_p3 = scmp.ne.s32.totalorder %s45_s22, %s3832_s17  ;;  %p3837_p4 = scmp.lt.s32.totalorder %s45_s22, %s45_s22 }
   0xe   :  { %p3838_p5 = scmp.lt.s32.totalorder %s3836_s18, %s3832_s17 }
  0x10   :  { %p3839_p6 = por %p3838_p5, %p3837_p4 }
  0x12   :  { %p3840_p7 = pnand %p3839_p6, %p3833_p3 }
  0x14   :  { %3843 = shalt.err (!%p3840_p7)
}
  0x15   :  { %47 = dma.hbm_to_vmem [thread:$0]  %s4733_s3, 16, %s45_s22, [#allocation6]  }
  0x16   :  { %s3844_s25 = scalar_lea.hbm %s4731_s1, 64 }
  0x17   :  { %p3845_p8 = scmp.ne.s32.totalorder %s4731_s1, %s3844_s25  ;;  %p3848_p9 = scmp.lt.u32.totalorder %s3844_s25, %s4731_s1 }
  0x19   :  { %p3850_p10 = pnand %p3848_p9, %p3845_p8 }
  0x1b   :  { %3853 = shalt.err (!%p3850_p10)
}
  0x1c   :  { %s3854_s30 = scalar_lea.vmem %s33_s24, 64  ;;  %p3859_p12 = scmp.lt.s32.totalorder %s33_s24, %s33_s24 }
  0x1d   :  { %p3855_p11 = scmp.ne.s32.totalorder %s33_s24, %s3854_s30  ;;  %p3860_p13 = scmp.lt.s32.totalorder %s3854_s30, %s3854_s30 }
  0x1f   :  { %p3861_p0 = por %p3860_p13, %p3859_p12 }
  0x21   :  { %p3862_p1 = pnand %p3861_p0, %p3855_p11 }
  0x23   :  { %3865 = shalt.err (!%p3862_p1)
}
  0x24   :  { %35 = dma.hbm_to_vmem [thread:$0]  %s4731_s1, 64, %s33_s24, [#allocation3]  }
  0x25   :  { %s3918_s0 = smov [#allocation7]   ;;  %s3866_s20 = scalar_lea.hbm %s4740_s10, 512 }
  0x26   :  { %s65_s17 = sshll.u32 %s3918_s0, 4  ;;  %p3867_p2 = scmp.ne.s32.totalorder %s4740_s10, %s3866_s20  ;;  %s66_s17 = int_to_ptr.vmem [resolvable:$true] %s65_s17 }
  0x27   :  { %p3870_p3 = scmp.lt.u32.totalorder %s3866_s20, %s4740_s10 }
  0x29   :  { %p3872_p4 = pnand %p3870_p3, %p3867_p2 }
  0x2b   :  { %3875 = shalt.err (!%p3872_p4)
}
  0x2c   :  { %s3876_s27 = scalar_lea.vmem %s66_s17, 512  ;;  %p3881_p6 = scmp.lt.s32.totalorder %s66_s17, %s66_s17 }
  0x2d   :  { %p3877_p5 = scmp.ne.s32.totalorder %s66_s17, %s3876_s27  ;;  %p3882_p7 = scmp.lt.s32.totalorder %s3876_s27, %s3876_s27 }
  0x2f   :  { %p3883_p8 = por %p3882_p7, %p3881_p6 }
  0x31   :  { %p3884_p9 = pnand %p3883_p8, %p3877_p5 }
  0x33   :  { %3887 = shalt.err (!%p3884_p9)
}
  0x34   :  { %s3919_s1 = smov 64   ;;  %s3920_s24 = smov 4  }
  0x35   :  { %71 = dma.hbm_to_vmem [thread:$0]  %s4740_s10, 512, %s66_s17, [#allocation6], %s3919_s1, %s3919_s1, %s3920_s24  }
  0x36   :  { %3910 = dma.done.wait [#allocation3], 64  }
  0x37   :  { %3911 = vsyncadd [#allocation3], 4294967232 }
  0x38   :  { %3912 = dma.done.wait [#allocation6], 528  }
  0x39   :  { %3913 = vsyncadd [#allocation6], 4294966768  ;;  %vm99_vm0 = vcmask 261120   ;;  %s4749_s22 = sld [smem:[#allocation12_spill]]  ;;  %v3682_v28 = vld [vmem:[%s4734_s4] sm:$0xff]   ;;  %v3683_v29 = vld [vmem:[%s4734_s4 + $0x8] sm:$0xff]  }
  0x3a   :  { %3366 = vmatprep.subr.bf16.mxu1 %v3682_v28  ;;  %v3156_v44 = vld [vmem:[%s4732_s2] ss:$0 sm:$0xff]  ;;  %v3157_v49 = vld [vmem:[#allocation5] ss:$0 sm:$0xff]  ;;  %v3921_v62 = vmov 0.0   ;;  %vm3922_vm1 = vmmov 0  }
  0x3b   :  { %3367 = vmatpush3.bf16.msra.mxu1 %v3682_v28  ;;  %3380 = vmatprep.subr.bf16.mxu0 %v3921_v62  ;;  %s3923_s29 = smov 112   ;;  %s3924_s30 = smov 96   ;;  %vm327_vm2 = vcmask 130048   ;;  %vm717_vm3 = vcmask 64512   ;;  %vm819_vm4 = vcmask 1043456   ;;  %vm1534_vm5 = vcmask 523264  }
  0x3c   :  { %3368 = vmatprep.subr.bf16.mxu1 %v3683_v29  ;;  %3382 = vmatprep.mubr.msk.bf16.mxu0 %vm3922_vm1, %v3921_v62  ;;  %s3926_s0 = smov 16   ;;  %vm3129_vm6 = vcmask 1041409   ;;  %vm3132_vm7 = vcmask 1042434   ;;  %vm3135_vm8 = vcmask 1043459   ;;  %vm3138_vm9 = vcmask 257024  }
  0x3f   :  { %v93_v0 = vld [vmem:[%s4749_s22] sm:$0xff]  ;;  %v95_v1 = vld [vmem:[%s4749_s22 + $0x10] sm:$0xff]  ;;  %v94_v2 = vld [vmem:[%s4749_s22 + $0x8] sm:$0xff]  ;;  %3369 = vmatpush3.bf16.msra.mxu1 %v3683_v29 }
  0x40   :  { %v100_v3 = vsel %vm99_vm0, %v93_v0, 0.0  ;;  %v106_v4 = vsel %vm99_vm0, %v95_v1, 0.0  ;;  %v96_v5 = vld [vmem:[%s4749_s22 + $0x18] sm:$0xff]  ;;  %v103_v6 = vsel %vm99_vm0, %v94_v2, 0.0  ;;  %3374 = vmatprep.subr.bf16.mxu1 %v3921_v62 }
  0x41   :  { %101 = vadd.xlane.f32.xlu0 %v100_v3  ;;  %107 = vadd.xlane.f32.xlu1 %v106_v4  ;;  %v109_v7 = vsel %vm99_vm0, %v96_v5, 0.0 }
  0x45   :  { %104 = vadd.xlane.f32.xlu0 %v103_v6  ;;  %110 = vadd.xlane.f32.xlu1 %v109_v7 }
  0xce   :  { %v102_v8 = vpop.xlane.xlu0 %101  ;;  %v108_v9 = vpop.xlane.xlu1 %107 }
  0xcf   :  { %v113_v10 = vmul.f32 0.03125, %v102_v8  ;;  %v115_v11 = vmul.f32 0.03125, %v108_v9 }
  0xd1   :  { %v117_v12 = vsub.f32 %v93_v0, %v113_v10  ;;  %v119_v13 = vsub.f32 %v95_v1, %v115_v11  ;;  %v3158_v0 = vld [vmem:[%s4735_s5] ss:$0 sm:$0xff] }
  0xd2   :  { %v105_v14 = vpop.xlane.xlu0 %104  ;;  %v111_v15 = vpop.xlane.xlu1 %110 }
  0xd3   :  { %v114_v16 = vmul.f32 0.03125, %v105_v14  ;;  %v116_v17 = vmul.f32 0.03125, %v111_v15  ;;  %v121_v18 = vmul.f32 %v117_v12, %v117_v12  ;;  %v123_v19 = vmul.f32 %v119_v13, %v119_v13 }
  0xd5   :  { %v118_v20 = vsub.f32 %v94_v2, %v114_v16  ;;  %v120_v21 = vsub.f32 %v96_v5, %v116_v17  ;;  %v125_v22 = vsel %vm99_vm0, %v121_v18, 0.0  ;;  %v131_v23 = vsel %vm99_vm0, %v123_v19, 0.0 }
  0xd6   :  { %126 = vadd.xlane.f32.xlu0 %v125_v22 }
  0xd7   :  { %v122_v24 = vmul.f32 %v118_v20, %v118_v20  ;;  %v124_v25 = vmul.f32 %v120_v21, %v120_v21 }
  0xd9   :  { %v128_v26 = vsel %vm99_vm0, %v122_v24, 0.0  ;;  %v134_v27 = vsel %vm99_vm0, %v124_v25, 0.0 }
  0xda   :  { %132 = vadd.xlane.f32.xlu0 %v131_v23  ;;  %129 = vadd.xlane.f32.xlu1 %v128_v26 }
  0xde   :  { %135 = vadd.xlane.f32.xlu1 %v134_v27 }
 0x163   :  { %v127_v30 = vpop.xlane.xlu0 %126 }
 0x164   :  { %v137_v31 = vmul.f32 0.03125, %v127_v30 }
 0x166   :  { %v141_v32 = vadd.f32 1e-12, %v137_v31 }
 0x167   :  { %v130_v33 = vpop.xlane.xlu1 %129  ;;  %v133_v34 = vpop.xlane.xlu0 %132 }
 0x168   :  { %3702 = vrsqrt.f32 %v141_v32  ;;  %v138_v35 = vmul.f32 0.03125, %v130_v33  ;;  %v139_v36 = vmul.f32 0.03125, %v133_v34 }
 0x16a   :  { %v142_v37 = vadd.f32 1e-12, %v138_v35  ;;  %v143_v38 = vadd.f32 1e-12, %v139_v36 }
 0x16b   :  { %v136_v39 = vpop.xlane.xlu1 %135 }
 0x16c   :  { %3704 = vrsqrt.f32 %v142_v37  ;;  %v140_v40 = vmul.f32 0.03125, %v136_v39 }
 0x16d   :  { %3706 = vrsqrt.f32 %v143_v38 }
 0x16e   :  { %v144_v41 = vadd.f32 1e-12, %v140_v40  ;;  %v3925_v40 = vmov 1966171168  }
 0x170   :  { %3708 = vrsqrt.f32 %v144_v41  ;;  %v177_v41 = vunpack.c.l.s4 %v3925_v40 }
 0x172   :  { %v3703_v42 = vpop.eup %3702 }
 0x173   :  { %v149_v43 = vmul.f32 %v3703_v42, %v117_v12  ;;  %v179_v42 = vlaneseq }
 0x175   :  { %v159_v48 = vmul.f32 %v3156_v44, %v149_v43  ;;  %v92_v43 = vld [vmem:[#allocation2] sm:$0xf] }
 0x176   :  { %v3705_v45 = vpop.eup %3704 }
 0x177   :  { %v3707_v46 = vpop.eup %3706  ;;  %v150_v47 = vmul.f32 %v3705_v45, %v118_v20  ;;  %v4080_v53 = vadd.f32 %v3157_v49, %v159_v48  ;;  %v178_v45 = vunpack.c.0.s8 %v177_v41 }
 0x178   :  { %v151_v50 = vmul.f32 %v3707_v46, %v119_v13  ;;  %v180_v46 = vshrl.u32 %v179_v42, 7 }
 0x179   :  { %v160_v51 = vmul.f32 %v3156_v44, %v150_v47 }
 0x17a   :  { %v3709_v52 = vpop.eup %3708  ;;  %v161_v56 = vmul.f32 %v3156_v44, %v151_v50  ;;  %v181_v48 = vsub.s32 %v178_v45, %v180_v46 }
 0x17b   :  { %v4082_v54 = vadd.f32 %v3157_v49, %v160_v51  ;;  %v152_v55 = vmul.f32 %v3709_v52, %v120_v21  ;;  %v306_v51 = vsub.s32 0, %v180_v46 }
 0x17c   :  { %v4087_v59 = vadd.f32 %v3157_v49, %v161_v56 }
 0x17d   :  { %v200_v57 = vpack.c.bf16 %v4082_v54, %v4080_v53  ;;  %v162_v58 = vmul.f32 %v3156_v44, %v152_v55  ;;  %v173_v44 = vsub.f32 1.0, %v92_v43 }
 0x17f   :  { %3370 = vmatprep.mubr.msk.bf16.mxu1 %vm99_vm0, %v200_v57  ;;  %v4089_v60 = vadd.f32 %v3157_v49, %v162_v58  ;;  %v174_v47 = vmul.f32 -1e+09, %v173_v44 }
 0x181   :  { %v201_v61 = vpack.c.bf16 %v4089_v60, %v4087_v59  ;;  %v182_v49 = vrot.slane %v174_v47, %v181_v48 }
 0x183   :  { %3371 = vmatmul.mubr.msk.bf16.vlgmr.msra.gmra.mrb[0].mxu1 %vm99_vm0, %v201_v61  ;;  %v190_v50 = vrot.slane %v182_v49, %v181_v48  ;;  %v183_v52 = vcombine.high %v182_v49, %v182_v49 }
 0x184   :  { %3376 = vmatprep.mubr.msk.bf16.mxu1 %vm3922_vm1, %v3921_v62 }
 0x185   :  { %v4185_v55 = vrot.slane %v190_v50, %v306_v51  ;;  %v197_v56 = vrot.slane %v183_v52, %v181_v48 }
 0x256   :  { %v3372_v63 = vpop.f32.mrb[0].mxu1 }
 0x257   :  { %v265_v1 = vpop.f32.mrb[1].mxu1  ;;  %v274_v3 = vadd.f32 %v3372_v63, %v3158_v0  ;;  %v4190_v63 = vrot.slane %v197_v56, %v306_v51 }
 0x258   :  { %v3373_v2 = vpop.f32.mrb[2].mxu1  ;;  %v266_v6 = vadd.f32 %v3158_v0, %v265_v1 }
 0x259   :  { %v277_v4 = vadd.f32 %v3373_v2, %v3158_v0  ;;  %v268_v5 = vpop.f32.mrb[3].mxu1  ;;  %v4107_v11 = vpack.c.bf16 %v274_v3, %v274_v3 }
 0x25a   :  { %v269_v7 = vadd.f32 %v3158_v0, %v268_v5  ;;  %v4105_v10 = vpack.c.bf16 %v266_v6, %v266_v6  ;;  %v198_v0 = vcombine.high %v190_v50, %v190_v50 }
 0x25b   :  { %v3647_v8 = vpack.i.bf16 %v277_v4, %v274_v3  ;;  %v4117_v13 = vpack.c.bf16 %v277_v4, %v277_v4 }
 0x25c   :  { %v3642_v9 = vpack.i.bf16 %v269_v7, %v266_v6  ;;  %v4113_v12 = vpack.c.bf16 %v269_v7, %v269_v7  ;;  %v4197_v7 = vrot.slane %v198_v0, %v306_v51 }
 0x25d   :  { %3648 = vrot.lane.b32.xlu1 %v3647_v8, %s3923_s29  ;;  %v199_v8 = vcombine.high %v197_v56, %v197_v56 }
 0x25e   :  { %3643 = vrot.lane.b32.xlu0 %v3642_v9, %s3923_s29 }
 0x261   :  { %325 = vrot.lane.b32.xlu1 %v4105_v10, %s3924_s30 }
 0x262   :  { %424 = vrot.lane.b32.xlu0 %v4107_v11, %s3924_s30 }
 0x265   :  { %375 = vrot.lane.b32.xlu1 %v4113_v12, %s3924_s30 }
 0x269   :  { %473 = vrot.lane.b32.xlu1 %v4117_v13, %s3924_s30 }
 0x2cf   :  { %v3649_v14 = vpop.permute.xlu1 %3648 }
 0x2d0   :  { %v3644_v15 = vpop.permute.xlu0 %3643  ;;  %v3651_v18 = vunpack.i.h.bf16 %v3649_v14  ;;  %v3650_v19 = vunpack.i.l.bf16 %v3649_v14 }
 0x2d1   :  { %v3646_v16 = vunpack.i.h.bf16 %v3644_v15  ;;  %v3645_v17 = vunpack.i.l.bf16 %v3644_v15 }
 0x2d2   :  { %v4130_v25 = vpack.c.bf16 %v3650_v19, %v3650_v19  ;;  %v4132_v26 = vpack.c.bf16 %v3651_v18, %v3651_v18  ;;  %v4202_v19 = vrot.slane %v199_v8, %v306_v51 }
 0x2d3   :  { %v326_v20 = vpop.permute.xlu1 %325  ;;  %v4121_v21 = vpack.c.bf16 %v3645_v17, %v3645_v17  ;;  %v4123_v22 = vpack.c.bf16 %v3646_v16, %v3646_v16 }
 0x2d4   :  { %v332_v23 = vsel %vm327_vm2, %v326_v20, 0  ;;  %v425_v28 = vpop.permute.xlu0 %424 }
 0x2d5   :  { %522 = vrot.lane.b32.xlu0 %v4121_v21, %s3924_s30  ;;  %571 = vrot.lane.b32.xlu1 %v4123_v22, %s3924_s30  ;;  %v430_v29 = vsel %vm327_vm2, %v425_v28, 0 }
 0x2d6   :  { %3375 = vmatpush3.bf16.xpose.msra.mxu1 %v332_v23 }
 0x2d7   :  { %v376_v24 = vpop.permute.xlu1 %375  ;;  %3386 = vmatprep.subr.bf16.mxu1 %v3921_v62 }
 0x2d8   :  { %v381_v27 = vsel %vm327_vm2, %v376_v24, 0 }
 0x2d9   :  { %620 = vrot.lane.b32.xlu0 %v4130_v25, %s3924_s30  ;;  %669 = vrot.lane.b32.xlu1 %v4132_v26, %s3924_s30 }
 0x2da   :  { %3381 = vmatpush3.bf16.xpose.msra.mxu0 %v381_v27 }
 0x2db   :  { %3392 = vmatprep.subr.bf16.mxu0 %v3921_v62  ;;  %v474_v30 = vpop.permute.xlu1 %473 }
 0x2dc   :  { %v479_v31 = vsel %vm327_vm2, %v474_v30, 0 }
 0x2dd   :  { %3377 = vmatmul.mubr.msk.bf16.vlgmr.msra.gmra.mrb[4].mxu1 %vm327_vm2, %v4105_v10 }
 0x2de   :  { %3387 = vmatpush3.bf16.xpose.msra.mxu1 %v430_v29  ;;  %3388 = vmatprep.mubr.msk.bf16.mxu1 %vm3922_vm1, %v3921_v62 }
 0x2df   :  { %3398 = vmatprep.subr.bf16.mxu1 %v3921_v62 }
 0x2e1   :  { %3383 = vmatmul.mubr.msk.bf16.vlgmr.msra.gmra.mrb[0].mxu0 %vm327_vm2, %v4113_v12 }
 0x2e2   :  { %3393 = vmatpush3.bf16.xpose.msra.mxu0 %v479_v31  ;;  %3394 = vmatprep.mubr.msk.bf16.mxu0 %vm3922_vm1, %v3921_v62 }
 0x2e3   :  { %3404 = vmatprep.subr.bf16.mxu0 %v3921_v62 }
 0x2e5   :  { %3389 = vmatmul.mubr.msk.bf16.vlgmr.msra.gmra.mrb[8].mxu1 %vm327_vm2, %v4107_v11 }
 0x2e6   :  { %3400 = vmatprep.mubr.msk.bf16.mxu1 %vm3922_vm1, %v3921_v62 }
 0x2e9   :  { %3395 = vmatmul.mubr.msk.bf16.vlgmr.msra.gmra.mrb[4].mxu0 %vm327_vm2, %v4117_v13 }
 0x2ea   :  { %3406 = vmatprep.mubr.msk.bf16.mxu0 %vm3922_vm1, %v3921_v62 }
 0x347   :  { %v523_v32 = vpop.permute.xlu0 %522  ;;  %v572_v33 = vpop.permute.xlu1 %571 }
 0x348   :  { %v528_v34 = vsel %vm327_vm2, %v523_v32, 0  ;;  %v577_v35 = vsel %vm327_vm2, %v572_v33, 0 }
 0x349   :  { %3399 = vmatpush3.bf16.xpose.msra.mxu1 %v528_v34  ;;  %3405 = vmatpush3.bf16.xpose.msra.mxu0 %v577_v35 }
 0x34a   :  { %3410 = vmatprep.subr.bf16.mxu1 %v3921_v62  ;;  %3416 = vmatprep.subr.bf16.mxu0 %v3921_v62 }
 0x34b   :  { %v621_v36 = vpop.permute.xlu0 %620  ;;  %v670_v37 = vpop.permute.xlu1 %669 }
 0x34c   :  { %v626_v38 = vsel %vm327_vm2, %v621_v36, 0  ;;  %v675_v39 = vsel %vm327_vm2, %v670_v37, 0 }
 0x350   :  { %3401 = vmatmul.mubr.msk.bf16.vlgmr.msra.gmra.mrb[12].mxu1 %vm327_vm2, %v4121_v21  ;;  %3407 = vmatmul.mubr.msk.bf16.vlgmr.msra.gmra.mrb[8].mxu0 %vm327_vm2, %v4123_v22 }
 0x351   :  { %3411 = vmatpush3.bf16.xpose.msra.mxu1 %v626_v38  ;;  %3417 = vmatpush3.bf16.xpose.msra.mxu0 %v675_v39 }
 0x352   :  { %3412 = vmatprep.mubr.msk.bf16.mxu1 %vm3922_vm1, %v3921_v62  ;;  %3418 = vmatprep.mubr.msk.bf16.mxu0 %vm3922_vm1, %v3921_v62 }
 0x353   :  { %3428 = vmatprep.subr.bf16.mxu0 %v3921_v62  ;;  %3422 = vmatprep.subr.bf16.mxu1 %v3921_v62 }
 0x358   :  { %3413 = vmatmul.mubr.msk.bf16.vlgmr.msra.gmra.mrb[16].mxu1 %vm327_vm2, %v4130_v25  ;;  %3419 = vmatmul.mubr.msk.bf16.vlgmr.msra.gmra.mrb[12].mxu0 %vm327_vm2, %v4132_v26 }
 0x359   :  { %3424 = vmatprep.mubr.msk.bf16.mxu1 %vm3922_vm1, %v3921_v62  ;;  %3430 = vmatprep.mubr.msk.bf16.mxu0 %vm3922_vm1, %v3921_v62 }
 0x3b0   :  { %v368_v57 = vpop.f32.mrb[4].mxu1 }
 0x3b1   :  { %v4188_v58 = vadd.f32 %v368_v57, %v4185_v55  ;;  %v3378_v61 = vpop.f32.mrb[5].mxu1 }
 0x3b2   :  { %v371_v1 = vpop.f32.mrb[6].mxu1 }
 0x3b3   :  { %v3379_v2 = vpop.f32.mrb[7].mxu1  ;;  %v718_v3 = vsel %vm717_vm3, %v4188_v58, -inf }
 0x3b4   :  { %v417_v4 = vpop.f32.mrb[0].mxu0  ;;  %719 = vmax.xlane.f32.xlu0 %v718_v3 }
 0x3b5   :  { %v4195_v5 = vadd.f32 %v417_v4, %v4190_v63  ;;  %v3384_v6 = vpop.f32.mrb[1].mxu0 }
 0x3b6   :  { %v420_v9 = vpop.f32.mrb[2].mxu0 }
 0x3b7   :  { %v3385_v14 = vpop.f32.mrb[3].mxu0  ;;  %v721_v15 = vsel %vm717_vm3, %v4195_v5, -inf }
 0x3b8   :  { %v466_v16 = vpop.f32.mrb[8].mxu1  ;;  %722 = vmax.xlane.f32.xlu1 %v721_v15 }
 0x3b9   :  { %v467_v17 = vadd.f32 %v466_v16, %v4197_v7  ;;  %v3390_v18 = vpop.f32.mrb[9].mxu1 }
 0x3ba   :  { %v469_v20 = vpop.f32.mrb[10].mxu1 }
 0x3bb   :  { %v3391_v23 = vpop.f32.mrb[11].mxu1  ;;  %v724_v24 = vsel %vm717_vm3, %v467_v17, -inf }
 0x3bc   :  { %v515_v27 = vpop.f32.mrb[4].mxu0  ;;  %725 = vmax.xlane.f32.xlu0 %v724_v24 }
 0x3bd   :  { %v4206_v28 = vadd.f32 %v515_v27, %v4202_v19  ;;  %v3396_v29 = vpop.f32.mrb[5].mxu0 }
 0x3be   :  { %v518_v30 = vpop.f32.mrb[6].mxu0 }
 0x3bf   :  { %v3397_v31 = vpop.f32.mrb[7].mxu0  ;;  %v727_v32 = vsel %vm717_vm3, %v4206_v28, -inf }
 0x3c0   :  { %728 = vmax.xlane.f32.xlu0 %v727_v32 }
 0x423   :  { %v564_v33 = vpop.f32.mrb[12].mxu1  ;;  %v613_v34 = vpop.f32.mrb[8].mxu0 }
 0x424   :  { %v565_v35 = vadd.f32 %v564_v33, %v4185_v55  ;;  %v4212_v36 = vadd.f32 %v613_v34, %v4190_v63  ;;  %v3402_v37 = vpop.f32.mrb[13].mxu1  ;;  %v3408_v38 = vpop.f32.mrb[9].mxu0 }
 0x425   :  { %v567_v39 = vpop.f32.mrb[14].mxu1  ;;  %v616_v40 = vpop.f32.mrb[10].mxu0 }
 0x426   :  { %v3403_v41 = vpop.f32.mrb[15].mxu1  ;;  %v3409_v42 = vpop.f32.mrb[11].mxu0  ;;  %v733_v43 = vsel %vm717_vm3, %v4212_v36, -inf  ;;  %v730_v44 = vsel %vm717_vm3, %v565_v35, -inf }
 0x427   :  { %734 = vmax.xlane.f32.xlu1 %v733_v43  ;;  %731 = vmax.xlane.f32.xlu0 %v730_v44 }
 0x42b   :  { %v662_v45 = vpop.f32.mrb[16].mxu1  ;;  %v711_v46 = vpop.f32.mrb[12].mxu0 }
 0x42c   :  { %v663_v47 = vadd.f32 %v662_v45, %v4197_v7  ;;  %v3414_v48 = vpop.f32.mrb[17].mxu1  ;;  %v3420_v49 = vpop.f32.mrb[13].mxu0  ;;  %v712_v6 = vadd.f32 %v711_v46, %v4202_v19 }
 0x42d   :  { %v665_v50 = vpop.f32.mrb[18].mxu1  ;;  %v714_v51 = vpop.f32.mrb[14].mxu0 }
 0x42e   :  { %v3415_v52 = vpop.f32.mrb[19].mxu1  ;;  %v3421_v56 = vpop.f32.mrb[15].mxu0  ;;  %v736_v57 = vsel %vm717_vm3, %v663_v47, -inf  ;;  %v739_v8 = vsel %vm717_vm3, %v712_v6, -inf }
 0x42f   :  { %737 = vmax.xlane.f32.xlu0 %v736_v57 }
 0x438   :  { %863 = vrot.lane.b32.xlu1 %v4113_v12, %s3919_s1 }
 0x43c   :  { %911 = vrot.lane.b32.xlu1 %v4107_v11, %s3919_s1 }
 0x441   :  { %v720_v61 = vpop.xlane.xlu0 %719 }
 0x442   :  { %v742_v0 = vsub.f32 %v4188_v58, %v720_v61 }
 0x444   :  { %v750_v2 = vmul.f32 1.442695, %v742_v0 }
 0x445   :  { %814 = vrot.lane.b32.xlu0 %v4105_v10, %s3919_s1  ;;  %v723_v9 = vpop.xlane.xlu1 %722 }
 0x446   :  { %3710 = vpow2.f32 %v750_v2  ;;  %v743_v14 = vsub.f32 %v4195_v5, %v723_v9 }
 0x448   :  { %v752_v15 = vmul.f32 1.442695, %v743_v14 }
 0x449   :  { %v726_v1 = vpop.xlane.xlu0 %725 }
 0x44a   :  { %v744_v3 = vsub.f32 %v467_v17, %v726_v1 }
 0x44c   :  { %v754_v4 = vmul.f32 1.442695, %v744_v3 }
 0x44d   :  { %v729_v18 = vpop.xlane.xlu0 %728 }
 0x44e   :  { %3712 = vpow2.f32 %v754_v4 }
 0x44f   :  { %3714 = vpow2.f32 %v752_v15 }
 0x450   :  { %v4228_v12 = vpop.eup %3710 }
 0x451   :  { %v766_v11 = vsel %vm717_vm3, %v4228_v12, 0.0 }
 0x458   :  { %v4232_v10 = vpop.eup %3712 }
 0x459   :  { %v772_v58 = vsel %vm717_vm3, %v4232_v10, 0.0  ;;  %v4241_v16 = vpop.eup %3714 }
 0x45a   :  { %v769_v17 = vsel %vm717_vm3, %v4241_v16, 0.0 }
 0x460   :  { %740 = vmax.xlane.f32.xlu1 %v739_v8 }
 0x464   :  { %767 = vadd.xlane.f32.xlu0 %v766_v11 }
 0x468   :  { %773 = vadd.xlane.f32.xlu0 %v772_v58 }
 0x471   :  { %959 = vrot.lane.b32.xlu1 %v4117_v13, %s3919_s1  ;;  %v745_v13 = vsub.f32 %v4206_v28, %v729_v18 }
 0x473   :  { %v756_v5 = vmul.f32 1.442695, %v745_v13 }
 0x47e   :  { %1007 = vrot.lane.b32.xlu0 %v4121_v21, %s3919_s1 }
 0x495   :  { %770 = vadd.xlane.f32.xlu1 %v769_v17 }
 0x4a6   :  { %1055 = vrot.lane.b32.xlu1 %v4123_v22, %s3919_s1 }
 0x4b4   :  { %v735_v20 = vpop.xlane.xlu1 %734  ;;  %v732_v23 = vpop.xlane.xlu0 %731 }
 0x4b5   :  { %v746_v24 = vsub.f32 %v565_v35, %v732_v23  ;;  %v747_v27 = vsub.f32 %v4212_v36, %v735_v20 }
 0x4b7   :  { %v758_v21 = vmul.f32 1.442695, %v746_v24  ;;  %v760_v22 = vmul.f32 1.442695, %v747_v27 }
 0x4b8   :  { %v864_v29 = vpop.permute.xlu1 %863 }
 0x4b9   :  { %v869_v30 = vsel %vm819_vm4, %v864_v29, 0  ;;  %3716 = vpow2.f32 %v758_v21 }
 0x4ba   :  { %3429 = vmatpush3.bf16.msra.mxu0 %v869_v30  ;;  %3718 = vpow2.f32 %v756_v5 }
 0x4bb   :  { %3440 = vmatprep.subr.bf16.mxu0 %v3921_v62  ;;  %3720 = vpow2.f32 %v760_v22 }
 0x4bc   :  { %v738_v31 = vpop.xlane.xlu0 %737  ;;  %v912_v43 = vpop.permute.xlu1 %911 }
 0x4bd   :  { %v748_v32 = vsub.f32 %v663_v47, %v738_v31  ;;  %v917_v57 = vsel %vm819_vm4, %v912_v43, 0 }
 0x4bf   :  { %v762_v28 = vmul.f32 1.442695, %v748_v32 }
 0x4c0   :  { %v815_v33 = vpop.permute.xlu0 %814 }
 0x4c1   :  { %3722 = vpow2.f32 %v762_v28  ;;  %v821_v34 = vsel %vm819_vm4, %v815_v33, 0 }
 0x4c2   :  { %3423 = vmatpush3.bf16.msra.mxu1 %v821_v34 }
 0x4c3   :  { %3434 = vmatprep.subr.bf16.mxu1 %v3921_v62  ;;  %v4253_v35 = vpop.eup %3716 }
 0x4c4   :  { %v778_v36 = vsel %vm717_vm3, %v4253_v35, 0.0  ;;  %v4257_v37 = vpop.eup %3718 }
 0x4c5   :  { %779 = vadd.xlane.f32.xlu0 %v778_v36  ;;  %v775_v38 = vsel %vm717_vm3, %v4257_v37, 0.0  ;;  %v4261_v39 = vpop.eup %3720 }
 0x4c6   :  { %v781_v42 = vsel %vm717_vm3, %v4261_v39, 0.0 }
 0x4ca   :  { %776 = vadd.xlane.f32.xlu1 %v775_v38 }
 0x4cb   :  { %v4263_v40 = vpop.eup %3722 }
 0x4cc   :  { %v784_v41 = vsel %vm717_vm3, %v4263_v40, 0.0 }
 0x4cd   :  { %785 = vadd.xlane.f32.xlu0 %v784_v41 }
 0x4ce   :  { %782 = vadd.xlane.f32.xlu1 %v781_v42 }
 0x4e3   :  { %1103 = vrot.lane.b32.xlu0 %v4130_v25, %s3919_s1 }
 0x4ed   :  { %v741_v44 = vpop.xlane.xlu1 %740 }
 0x4ee   :  { %v749_v45 = vsub.f32 %v712_v6, %v741_v44 }
 0x4f0   :  { %v764_v46 = vmul.f32 1.442695, %v749_v45 }
 0x4f1   :  { %v768_v47 = vpop.xlane.xlu0 %767  ;;  %v960_v3 = vpop.permute.xlu1 %959 }
 0x4f2   :  { %3724 = vpow2.f32 %v764_v46  ;;  %v965_v11 = vsel %vm819_vm4, %v960_v3, 0 }
 0x4f3   :  { %3726 = vrcp.f32 %v768_v47 }
 0x4f5   :  { %v774_v48 = vpop.xlane.xlu0 %773 }
 0x4f6   :  { %3728 = vrcp.f32 %v774_v48 }
 0x4f9   :  { %v1008_v0 = vpop.permute.xlu0 %1007 }
 0x4fa   :  { %v1013_v2 = vsel %vm819_vm4, %v1008_v0, 0  ;;  %v3684_v0 = vld [vmem:[%s4736_s6] sm:$0xff]  }
 0x4fc   :  { %v4271_v49 = vpop.eup %3724 }
 0x4fd   :  { %v3727_v50 = vpop.eup %3726  ;;  %v787_v51 = vsel %vm717_vm3, %v4271_v49, 0.0 }
 0x4fe   :  { %v798_v52 = vmul.f32 %v3727_v50, %v4228_v12  ;;  %788 = vadd.xlane.f32.xlu1 %v787_v51 }
 0x500   :  { %v806_v56 = vpack.c.bf16 %v798_v52, %v798_v52  ;;  %v3729_v25 = vpop.eup %3728 }
 0x501   :  { %v800_v61 = vmul.f32 %v3729_v25, %v4232_v10 }
 0x502   :  { %3425 = vmatmul.mubr.msk.bf16.vlgmr.msra.gmra.mrb[20].mxu1 %vm717_vm3, %v806_v56 }
 0x503   :  { %3435 = vmatpush3.bf16.msra.mxu1 %v917_v57  ;;  %3436 = vmatprep.mubr.msk.bf16.mxu1 %vm3922_vm1, %v3921_v62  ;;  %v808_v1 = vpack.c.bf16 %v800_v61, %v800_v61 }
 0x504   :  { %3446 = vmatprep.subr.bf16.mxu1 %v3921_v62 }
 0x50a   :  { %3437 = vmatmul.mubr.msk.bf16.vlgmr.msra.gmra.mrb[24].mxu1 %vm717_vm3, %v808_v1 }
 0x50b   :  { %3447 = vmatpush3.bf16.msra.mxu1 %v1013_v2  ;;  %3448 = vmatprep.mubr.msk.bf16.mxu1 %vm3922_vm1, %v3921_v62 }
 0x50c   :  { %3458 = vmatprep.subr.bf16.mxu1 %v3921_v62 }
 0x50f   :  { %1151 = vrot.lane.b32.xlu1 %v4132_v26, %s3919_s1 }
 0x522   :  { %v771_v4 = vpop.xlane.xlu1 %770 }
 0x523   :  { %3730 = vrcp.f32 %v771_v4 }
 0x526   :  { %v1056_v10 = vpop.permute.xlu1 %1055 }
 0x527   :  { %v1061_v29 = vsel %vm819_vm4, %v1056_v10, 0 }
 0x52d   :  { %v3731_v6 = vpop.eup %3730 }
 0x52e   :  { %v799_v8 = vmul.f32 %v3731_v6, %v4241_v16 }
 0x530   :  { %v807_v12 = vpack.c.bf16 %v799_v8, %v799_v8 }
 0x532   :  { %3431 = vmatmul.mubr.msk.bf16.vlgmr.msra.gmra.mrb[16].mxu0 %vm717_vm3, %v807_v12 }
 0x533   :  { %3441 = vmatpush3.bf16.msra.mxu0 %v965_v11  ;;  %3442 = vmatprep.mubr.msk.bf16.mxu0 %vm3922_vm1, %v3921_v62 }
 0x534   :  { %3452 = vmatprep.subr.bf16.mxu0 %v3921_v62 }
 0x552   :  { %v780_v58 = vpop.xlane.xlu0 %779 }
 0x553   :  { %3732 = vrcp.f32 %v780_v58  ;;  %v3685_v58 = vld [vmem:[%s4736_s6 + $0x8] sm:$0xff]  }
 0x557   :  { %v777_v26 = vpop.xlane.xlu1 %776 }
 0x558   :  { %3734 = vrcp.f32 %v777_v26 }
 0x55a   :  { %v786_v9 = vpop.xlane.xlu0 %785 }
 0x55b   :  { %3736 = vrcp.f32 %v786_v9  ;;  %v783_v14 = vpop.xlane.xlu1 %782 }
 0x55c   :  { %3738 = vrcp.f32 %v783_v14 }
 0x55d   :  { %v3733_v15 = vpop.eup %3732 }
 0x55e   :  { %v802_v16 = vmul.f32 %v3733_v15, %v4253_v35  ;;  %v1104_v17 = vpop.permute.xlu0 %1103 }
 0x55f   :  { %v1109_v23 = vsel %vm819_vm4, %v1104_v17, 0 }
 0x560   :  { %v810_v18 = vpack.c.bf16 %v802_v16, %v802_v16 }
 0x562   :  { %v3735_v13 = vpop.eup %3734  ;;  %3449 = vmatmul.mubr.msk.bf16.vlgmr.msra.gmra.mrb[28].mxu1 %vm717_vm3, %v810_v18 }
 0x563   :  { %v801_v20 = vmul.f32 %v3735_v13, %v4257_v37  ;;  %3459 = vmatpush3.bf16.msra.mxu1 %v1109_v23  ;;  %3460 = vmatprep.mubr.msk.bf16.mxu1 %vm3922_vm1, %v3921_v62 }
 0x564   :  { %3470 = vmatprep.subr.bf16.mxu1 %v3684_v0 }
 0x565   :  { %v3737_v24 = vpop.eup %3736  ;;  %v809_v21 = vpack.c.bf16 %v801_v20, %v801_v20 }
 0x566   :  { %v3739_v5 = vpop.eup %3738  ;;  %v804_v27 = vmul.f32 %v3737_v24, %v4263_v40 }
 0x567   :  { %3443 = vmatmul.mubr.msk.bf16.vlgmr.msra.gmra.mrb[20].mxu0 %vm717_vm3, %v809_v21  ;;  %v803_v22 = vmul.f32 %v3739_v5, %v4261_v39 }
 0x568   :  { %3453 = vmatpush3.bf16.msra.mxu0 %v1061_v29  ;;  %v812_v30 = vpack.c.bf16 %v804_v27, %v804_v27  ;;  %3454 = vmatprep.mubr.msk.bf16.mxu0 %vm3922_vm1, %v3921_v62 }
 0x569   :  { %3464 = vmatprep.subr.bf16.mxu0 %v3921_v62  ;;  %v811_v31 = vpack.c.bf16 %v803_v22, %v803_v22 }
 0x56a   :  { %3461 = vmatmul.mubr.msk.bf16.vlgmr.msra.gmra.mrb[32].mxu1 %vm717_vm3, %v812_v30 }
 0x56b   :  { %3471 = vmatpush3.bf16.msra.mxu1 %v3684_v0 }
 0x56c   :  { %3472 = vmatprep.subr.bf16.mxu1 %v3685_v58 }
 0x56f   :  { %3455 = vmatmul.mubr.msk.bf16.vlgmr.msra.gmra.mrb[24].mxu0 %vm717_vm3, %v811_v31  ;;  %3473 = vmatpush3.bf16.msra.mxu1 %v3685_v58  ;;  %v3179_v31 = vld [vmem:[%s4737_s7] ss:$0 sm:$0xff] }
 0x570   :  { %3466 = vmatprep.mubr.msk.bf16.mxu0 %vm3922_vm1, %v3921_v62 }
 0x58b   :  { %v789_v32 = vpop.xlane.xlu1 %788 }
 0x58c   :  { %3740 = vrcp.f32 %v789_v32 }
 0x58f   :  { %v1152_v28 = vpop.permute.xlu1 %1151 }
 0x590   :  { %v1157_v33 = vsel %vm819_vm4, %v1152_v28, 0 }
 0x591   :  { %3465 = vmatpush3.bf16.msra.mxu0 %v1157_v33 }
 0x596   :  { %v3741_v34 = vpop.eup %3740 }
 0x597   :  { %v805_v35 = vmul.f32 %v3741_v34, %v4271_v49 }
 0x599   :  { %v813_v36 = vpack.c.bf16 %v805_v35, %v805_v35 }
 0x59b   :  { %3467 = vmatmul.mubr.msk.bf16.vlgmr.msra.gmra.mrb[28].mxu0 %vm717_vm3, %v813_v36 }
 0x5d5   :  { %v857_v37 = vpop.f32.mrb[20].mxu1 }
 0x5d6   :  { %v3426_v38 = vpop.f32.mrb[21].mxu1 }
 0x5d7   :  { %v860_v39 = vpop.f32.mrb[22].mxu1 }
 0x5d8   :  { %v3427_v40 = vpop.f32.mrb[23].mxu1 }
 0x5dd   :  { %v953_v41 = vpop.f32.mrb[24].mxu1 }
 0x5de   :  { %v3438_v42 = vpop.f32.mrb[25].mxu1 }
 0x5df   :  { %v956_v43 = vpop.f32.mrb[26].mxu1 }
 0x5e0   :  { %v3439_v44 = vpop.f32.mrb[27].mxu1 }
 0x605   :  { %v905_v45 = vpop.f32.mrb[16].mxu0 }
 0x606   :  { %v3432_v46 = vpop.f32.mrb[17].mxu0 }
 0x607   :  { %v908_v47 = vpop.f32.mrb[18].mxu0 }
 0x608   :  { %v3433_v48 = vpop.f32.mrb[19].mxu0 }
 0x635   :  { %v1049_v50 = vpop.f32.mrb[28].mxu1 }
 0x636   :  { %v3450_v51 = vpop.f32.mrb[29].mxu1 }
 0x637   :  { %v1052_v52 = vpop.f32.mrb[30].mxu1 }
 0x638   :  { %v3451_v56 = vpop.f32.mrb[31].mxu1 }
 0x63a   :  { %v1001_v49 = vpop.f32.mrb[20].mxu0 }
 0x63b   :  { %v3444_v25 = vpop.f32.mrb[21].mxu0 }
 0x63c   :  { %v1004_v57 = vpop.f32.mrb[22].mxu0 }
 0x63d   :  { %v3445_v61 = vpop.f32.mrb[23].mxu0  ;;  %v1145_v1 = vpop.f32.mrb[32].mxu1 }
 0x63e   :  { %v3462_v2 = vpop.f32.mrb[33].mxu1 }
 0x63f   :  { %v1148_v3 = vpop.f32.mrb[34].mxu1 }
 0x640   :  { %v3463_v4 = vpop.f32.mrb[35].mxu1 }
 0x642   :  { %v1097_v6 = vpop.f32.mrb[24].mxu0 }
 0x643   :  { %v3652_v8 = vpack.i.bf16 %v1097_v6, %v1049_v50  ;;  %v3456_v12 = vpop.f32.mrb[25].mxu0 }
 0x644   :  { %v1100_v11 = vpop.f32.mrb[26].mxu0  ;;  %v3687_v12 = vld [vmem:[#allocation7 + $0x8] sm:$0xff]  }
 0x645   :  { %v3457_v10 = vpop.f32.mrb[27].mxu0  ;;  %3653 = vrot.lane.b32.xlu0 %v3652_v8, %s3926_s0  ;;  %v3686_v8 = vld [vmem:[#allocation7] sm:$0xff]  }
 0x646   :  { %3478 = vmatprep.subr.bf16.mxu0 %v3686_v8 }
 0x647   :  { %3479 = vmatpush3.bf16.msra.mxu0 %v3686_v8 }
 0x648   :  { %3480 = vmatprep.subr.bf16.mxu0 %v3687_v12 }
 0x64b   :  { %3481 = vmatpush3.bf16.msra.mxu0 %v3687_v12 }
 0x66e   :  { %v1193_v26 = vpop.f32.mrb[28].mxu0 }
 0x66f   :  { %v3657_v9 = vpack.i.bf16 %v1193_v26, %v1145_v1  ;;  %v3468_v14 = vpop.f32.mrb[29].mxu0 }
 0x670   :  { %v1196_v15 = vpop.f32.mrb[30].mxu0 }
 0x671   :  { %v3469_v16 = vpop.f32.mrb[31].mxu0  ;;  %3658 = vrot.lane.b32.xlu1 %v3657_v9, %s3926_s0 }
 0x6b7   :  { %v3654_v17 = vpop.permute.xlu0 %3653 }
 0x6b8   :  { %v3656_v18 = vunpack.i.h.bf16 %v3654_v17  ;;  %v3655_v13 = vunpack.i.l.bf16 %v3654_v17 }
 0x6ba   :  { %v1216_v20 = vsel %vm327_vm2, %v905_v45, %v3656_v18  ;;  %v1215_v23 = vsel %vm327_vm2, %v857_v37, %v3655_v13 }
 0x6bb   :  { %v1219_v24 = vpack.c.bf16 %v1216_v20, %v1215_v23 }
 0x6bd   :  { %3474 = vmatprep.mubr.msk.bf16.mxu1 %vm99_vm0, %v1219_v24  ;;  %v3184_v24 = vld [vmem:[%s4738_s8] ss:$0 sm:$0xff] }
 0x6e3   :  { %v3659_v21 = vpop.permute.xlu1 %3658 }
 0x6e4   :  { %v3661_v5 = vunpack.i.h.bf16 %v3659_v21  ;;  %v3660_v27 = vunpack.i.l.bf16 %v3659_v21 }
 0x6e6   :  { %v1218_v29 = vsel %vm327_vm2, %v1001_v49, %v3661_v5  ;;  %v1217_v30 = vsel %vm327_vm2, %v953_v41, %v3660_v27 }
 0x6e7   :  { %v1220_v22 = vpack.c.bf16 %v1218_v29, %v1217_v30 }
 0x6e9   :  { %3475 = vmatmul.mubr.msk.bf16.vlgmr.msra.gmra.mrb[36].mxu1 %vm99_vm0, %v1220_v22  ;;  %v3185_v22 = vld [vmem:[%s4739_s9] ss:$0 sm:$0xff] }
 0x7bc   :  { %v3476_v32 = vpop.f32.mrb[36].mxu1 }
 0x7bd   :  { %v1284_v28 = vpop.f32.mrb[37].mxu1  ;;  %v1293_v33 = vadd.f32 %v3476_v32, %v3179_v31 }
 0x7be   :  { %v1285_v34 = vadd.f32 %v3179_v31, %v1284_v28  ;;  %v3477_v35 = vpop.f32.mrb[38].mxu1 }
 0x7bf   :  { %v1287_v36 = vpop.f32.mrb[39].mxu1  ;;  %v1296_v39 = vadd.f32 %v3477_v35, %v3179_v31  ;;  %v1301_v42 = vadd.f32 %v1293_v33, %v4087_v59 }
 0x7c0   :  { %v1288_v37 = vadd.f32 %v3179_v31, %v1287_v36  ;;  %v1299_v38 = vadd.f32 %v1285_v34, %v4080_v53 }
 0x7c1   :  { %v1311_v44 = vsel %vm99_vm0, %v1301_v42, 0.0  ;;  %v1302_v45 = vadd.f32 %v1296_v39, %v4089_v60 }
 0x7c2   :  { %v1305_v40 = vsel %vm99_vm0, %v1299_v38, 0.0  ;;  %v1300_v41 = vadd.f32 %v1288_v37, %v4082_v54 }
 0x7c3   :  { %1306 = vadd.xlane.f32.xlu0 %v1305_v40  ;;  %v1314_v46 = vsel %vm99_vm0, %v1302_v45, 0.0 }
 0x7c4   :  { %v1308_v43 = vsel %vm99_vm0, %v1300_v41, 0.0 }
 0x7c5   :  { %1309 = vadd.xlane.f32.xlu1 %v1308_v43  ;;  %v3689_v43 = vld [vmem:[%s4742_s12 + $0x8] sm:$0xff]  }
 0x7c7   :  { %1312 = vadd.xlane.f32.xlu0 %v1311_v44  ;;  %v3690_v44 = vld [vmem:[%s4742_s12 + $0x10] sm:$0xff]  }
 0x7cb   :  { %1315 = vadd.xlane.f32.xlu0 %v1314_v46  ;;  %v3186_v46 = vld [vmem:[%s4741_s11] ss:$0 sm:$0xff] }
 0x850   :  { %v1307_v53 = vpop.xlane.xlu0 %1306 }
 0x851   :  { %v1317_v47 = vmul.f32 0.03125, %v1307_v53 }
 0x852   :  { %v1310_v48 = vpop.xlane.xlu1 %1309 }
 0x853   :  { %v1321_v50 = vsub.f32 %v1299_v38, %v1317_v47  ;;  %v1318_v51 = vmul.f32 0.03125, %v1310_v48 }
 0x854   :  { %v1313_v54 = vpop.xlane.xlu0 %1312 }
 0x855   :  { %v1322_v52 = vsub.f32 %v1300_v41, %v1318_v51  ;;  %v1319_v59 = vmul.f32 0.03125, %v1313_v54  ;;  %v1325_v56 = vmul.f32 %v1321_v50, %v1321_v50 }
 0x857   :  { %v1323_v49 = vsub.f32 %v1301_v42, %v1319_v59  ;;  %v1329_v25 = vsel %vm99_vm0, %v1325_v56, 0.0  ;;  %v1326_v57 = vmul.f32 %v1322_v52, %v1322_v52  ;;  %v3688_v42 = vld [vmem:[%s4742_s12] sm:$0xff]  }
 0x858   :  { %1330 = vadd.xlane.f32.xlu0 %v1329_v25  ;;  %v1316_v61 = vpop.xlane.xlu0 %1315  ;;  %3486 = vmatprep.subr.bf16.mxu1 %v3688_v42 }
 0x859   :  { %v1320_v60 = vmul.f32 0.03125, %v1316_v61  ;;  %v1332_v0 = vsel %vm99_vm0, %v1326_v57, 0.0  ;;  %v1327_v1 = vmul.f32 %v1323_v49, %v1323_v49  ;;  %3487 = vmatpush3.bf16.msra.mxu1 %v3688_v42 }
 0x85a   :  { %1333 = vadd.xlane.f32.xlu1 %v1332_v0  ;;  %3488 = vmatprep.subr.bf16.mxu1 %v3689_v43 }
 0x85b   :  { %v1324_v2 = vsub.f32 %v1302_v45, %v1320_v60  ;;  %v1335_v3 = vsel %vm99_vm0, %v1327_v1, 0.0  ;;  %v3691_v45 = vld [vmem:[%s4742_s12 + $0x18] sm:$0xff]  }
 0x85c   :  { %1336 = vadd.xlane.f32.xlu0 %v1335_v3 }
 0x85d   :  { %v1328_v4 = vmul.f32 %v1324_v2, %v1324_v2  ;;  %3489 = vmatpush3.bf16.msra.mxu1 %v3689_v43 }
 0x85e   :  { %3490 = vmatprep.subr.bf16.mxu1 %v3690_v44 }
 0x85f   :  { %v1338_v6 = vsel %vm99_vm0, %v1328_v4, 0.0 }
 0x860   :  { %1339 = vadd.xlane.f32.xlu1 %v1338_v6 }
 0x861   :  { %3491 = vmatpush3.bf16.msra.mxu1 %v3690_v44 }
 0x862   :  { %3492 = vmatprep.subr.bf16.mxu1 %v3691_v45 }
 0x865   :  { %3493 = vmatpush3.bf16.msra.mxu1 %v3691_v45 }
 0x866   :  { %3512 = vmatprep.subr.bf16.mxu1 %v3921_v62 }
 0x8e5   :  { %v1331_v11 = vpop.xlane.xlu0 %1330 }
 0x8e6   :  { %v1341_v10 = vmul.f32 0.03125, %v1331_v11 }
 0x8e7   :  { %v1334_v58 = vpop.xlane.xlu1 %1333 }
 0x8e8   :  { %v1345_v26 = vadd.f32 1e-12, %v1341_v10  ;;  %v1342_v9 = vmul.f32 0.03125, %v1334_v58 }
 0x8e9   :  { %v1337_v14 = vpop.xlane.xlu0 %1336 }
 0x8ea   :  { %3742 = vrsqrt.f32 %v1345_v26  ;;  %v1346_v15 = vadd.f32 1e-12, %v1342_v9  ;;  %v1343_v16 = vmul.f32 0.03125, %v1337_v14 }
 0x8ec   :  { %3744 = vrsqrt.f32 %v1346_v15  ;;  %v1347_v17 = vadd.f32 1e-12, %v1343_v16 }
 0x8ed   :  { %v1340_v18 = vpop.xlane.xlu1 %1339 }
 0x8ee   :  { %3746 = vrsqrt.f32 %v1347_v17  ;;  %v1344_v13 = vmul.f32 0.03125, %v1340_v18 }
 0x8f0   :  { %v1348_v20 = vadd.f32 1e-12, %v1344_v13 }
 0x8f2   :  { %3748 = vrsqrt.f32 %v1348_v20 }
 0x8f4   :  { %v3743_v23 = vpop.eup %3742 }
 0x8f5   :  { %v1353_v21 = vmul.f32 %v3743_v23, %v1321_v50 }
 0x8f6   :  { %v3745_v5 = vpop.eup %3744 }
 0x8f7   :  { %v1354_v27 = vmul.f32 %v3745_v5, %v1322_v52  ;;  %v1363_v29 = vmul.f32 %v3184_v24, %v1353_v21 }
 0x8f8   :  { %v3747_v30 = vpop.eup %3746 }
 0x8f9   :  { %v1355_v31 = vmul.f32 %v3747_v30, %v1323_v49  ;;  %v1364_v32 = vmul.f32 %v3184_v24, %v1354_v27  ;;  %v4350_v28 = vadd.f32 %v3185_v22, %v1363_v29 }
 0x8fb   :  { %v4352_v33 = vadd.f32 %v3185_v22, %v1364_v32  ;;  %v1365_v35 = vmul.f32 %v3184_v24, %v1355_v31 }
 0x8fc   :  { %v3749_v34 = vpop.eup %3748 }
 0x8fd   :  { %v1356_v36 = vmul.f32 %v3749_v34, %v1324_v2  ;;  %v1377_v37 = vpack.c.bf16 %v4352_v33, %v4350_v28  ;;  %v4357_v39 = vadd.f32 %v3185_v22, %v1365_v35 }
 0x8ff   :  { %v1366_v38 = vmul.f32 %v3184_v24, %v1356_v36  ;;  %3482 = vmatprep.mubr.msk.bf16.mxu0 %vm99_vm0, %v1377_v37  ;;  %v3191_v36 = vld [vmem:[%s4743_s13] ss:$0 sm:$0xff] }
 0x901   :  { %v4359_v40 = vadd.f32 %v3185_v22, %v1366_v38 }
 0x903   :  { %v1378_v41 = vpack.c.bf16 %v4359_v40, %v4357_v39 }
 0x905   :  { %3483 = vmatmul.mubr.msk.bf16.vlgmr.msra.gmra.mrb[32].mxu0 %vm99_vm0, %v1378_v41 }
 0x9d8   :  { %v3484_v53 = vpop.f32.mrb[32].mxu0 }
 0x9d9   :  { %v1451_v47 = vadd.f32 %v3484_v53, %v3186_v46  ;;  %v1442_v48 = vpop.f32.mrb[33].mxu0 }
 0x9da   :  { %v1443_v50 = vadd.f32 %v3186_v46, %v1442_v48  ;;  %v3485_v51 = vpop.f32.mrb[34].mxu0 }
 0x9db   :  { %v1463_v54 = vmul.f32 0.044715, %v1451_v47  ;;  %v1454_v52 = vadd.f32 %v3485_v51, %v3186_v46  ;;  %v1445_v59 = vpop.f32.mrb[35].mxu0  ;;  %v1459_v23 = vmul.f32 0.5, %v1451_v47 }
 0x9dc   :  { %v1461_v56 = vmul.f32 0.044715, %v1443_v50  ;;  %v1446_v49 = vadd.f32 %v3186_v46, %v1445_v59  ;;  %v1457_v5 = vmul.f32 0.5, %v1443_v50 }
 0x9dd   :  { %v1467_v25 = vmul.f32 %v1463_v54, %v1451_v47  ;;  %v1464_v57 = vmul.f32 0.044715, %v1454_v52  ;;  %v1460_v24 = vmul.f32 0.5, %v1454_v52 }
 0x9de   :  { %v1465_v61 = vmul.f32 %v1461_v56, %v1443_v50  ;;  %v1462_v60 = vmul.f32 0.044715, %v1446_v49  ;;  %v1458_v27 = vmul.f32 0.5, %v1446_v49 }
 0x9df   :  { %v1471_v0 = vmul.f32 %v1467_v25, %v1451_v47  ;;  %v1468_v1 = vmul.f32 %v1464_v57, %v1454_v52 }
 0x9e0   :  { %v1469_v2 = vmul.f32 %v1465_v61, %v1443_v50  ;;  %v1466_v3 = vmul.f32 %v1462_v60, %v1446_v49 }
 0x9e1   :  { %v1475_v4 = vadd.f32 %v1471_v0, %v1451_v47  ;;  %v1472_v6 = vmul.f32 %v1468_v1, %v1454_v52 }
 0x9e2   :  { %v1473_v8 = vadd.f32 %v1469_v2, %v1443_v50  ;;  %v1470_v12 = vmul.f32 %v1466_v3, %v1446_v49 }
 0x9e3   :  { %v1479_v11 = vmul.f32 0.7978846, %v1475_v4  ;;  %v1476_v10 = vadd.f32 %v1472_v6, %v1454_v52 }
 0x9e4   :  { %v1477_v58 = vmul.f32 0.7978846, %v1473_v8  ;;  %v1474_v26 = vadd.f32 %v1470_v12, %v1446_v49 }
 0x9e5   :  { %3750 = vtanh.f32 %v1479_v11  ;;  %v1480_v9 = vmul.f32 0.7978846, %v1476_v10 }
 0x9e6   :  { %3752 = vtanh.f32 %v1477_v58  ;;  %v1478_v14 = vmul.f32 0.7978846, %v1474_v26  ;;  %v3692_v58 = vld [vmem:[%s4734_s4 + $0x10] sm:$0xff]   ;;  %v3693_v26 = vld [vmem:[%s4734_s4 + $0x18] sm:$0xff]  }
 0x9e7   :  { %3754 = vtanh.f32 %v1480_v9  ;;  %3498 = vmatprep.subr.bf16.mxu0 %v3692_v58 }
 0x9e8   :  { %3756 = vtanh.f32 %v1478_v14  ;;  %3499 = vmatpush3.bf16.msra.mxu0 %v3692_v58 }
 0x9e9   :  { %3500 = vmatprep.subr.bf16.mxu0 %v3693_v26 }
 0x9ec   :  { %3501 = vmatpush3.bf16.msra.mxu0 %v3693_v26 }
 0x9ed   :  { %3506 = vmatprep.subr.bf16.mxu0 %v3921_v62 }
 0x9ef   :  { %v3751_v15 = vpop.eup %3750 }
 0x9f0   :  { %v3753_v16 = vpop.eup %3752  ;;  %v1487_v17 = vadd.f32 1.0, %v3751_v15 }
 0x9f1   :  { %v3755_v18 = vpop.eup %3754  ;;  %v1485_v13 = vadd.f32 1.0, %v3753_v16 }
 0x9f2   :  { %v3757_v20 = vpop.eup %3756  ;;  %v1488_v21 = vadd.f32 1.0, %v3755_v18  ;;  %v1491_v30 = vmul.f32 %v1487_v17, %v1459_v23 }
 0x9f3   :  { %v1486_v29 = vadd.f32 1.0, %v3757_v20  ;;  %v1489_v31 = vmul.f32 %v1485_v13, %v1457_v5 }
 0x9f4   :  { %v1492_v22 = vmul.f32 %v1488_v21, %v1460_v24 }
 0x9f5   :  { %v1490_v32 = vmul.f32 %v1486_v29, %v1458_v27  ;;  %v3198_v29 = vld [vmem:[%s4744_s14] ss:$0 sm:$0xff] }
 0x9f6   :  { %v1494_v34 = vpack.c.bf16 %v1492_v22, %v1491_v30 }
 0x9f7   :  { %v1493_v35 = vpack.c.bf16 %v1490_v32, %v1489_v31 }
 0x9f9   :  { %3494 = vmatprep.mubr.msk.bf16.mxu1 %vm1534_vm5, %v1493_v35  ;;  %v3199_v35 = vld [vmem:[%s4745_s15] ss:$0 sm:$0xff] }
 0x9fa   :  { %3495 = vmatmul.mubr.msk.bf16.vlgmr.msra.gmra.mrb[40].mxu1 %vm1534_vm5, %v1494_v34 }
 0x9fb   :  { %3514 = vmatprep.mubr.msk.bf16.mxu1 %vm3922_vm1, %v3921_v62 }
 0xacd   :  { %v3496_v37 = vpop.f32.mrb[40].mxu1 }
 0xace   :  { %v1575_v38 = vpop.f32.mrb[41].mxu1  ;;  %v1584_v41 = vadd.f32 %v3496_v37, %v3191_v36 }
 0xacf   :  { %v1576_v42 = vadd.f32 %v3191_v36, %v1575_v38  ;;  %v3497_v43 = vpop.f32.mrb[42].mxu1 }
 0xad0   :  { %v1578_v44 = vpop.f32.mrb[43].mxu1  ;;  %v1587_v45 = vadd.f32 %v3497_v43, %v3191_v36  ;;  %v1592_v50 = vadd.f32 %v1584_v41, %v4357_v39 }
 0xad1   :  { %v1579_v46 = vadd.f32 %v3191_v36, %v1578_v44  ;;  %v1590_v53 = vadd.f32 %v1576_v42, %v4350_v28 }
 0xad2   :  { %v1593_v54 = vadd.f32 %v1587_v45, %v4359_v40  ;;  %v1602_v52 = vsel %vm99_vm0, %v1592_v50, 0.0 }
 0xad3   :  { %v1596_v47 = vsel %vm99_vm0, %v1590_v53, 0.0  ;;  %v1591_v48 = vadd.f32 %v1579_v46, %v4352_v33 }
 0xad4   :  { %1597 = vadd.xlane.f32.xlu0 %v1596_v47  ;;  %v1605_v59 = vsel %vm99_vm0, %v1593_v54, 0.0 }
 0xad5   :  { %v1599_v51 = vsel %vm99_vm0, %v1591_v48, 0.0 }
 0xad6   :  { %1600 = vadd.xlane.f32.xlu1 %v1599_v51  ;;  %v3205_v51 = vld [vmem:[%s4735_s5 + $0x1] ss:$0 sm:$0xff] }
 0xad8   :  { %1603 = vadd.xlane.f32.xlu0 %v1602_v52 }
 0xada   :  { %1606 = vadd.xlane.f32.xlu1 %v1605_v59 }
 0xb61   :  { %v1598_v56 = vpop.xlane.xlu0 %1597 }
 0xb62   :  { %v1608_v28 = vmul.f32 0.03125, %v1598_v56 }
 0xb63   :  { %v1601_v49 = vpop.xlane.xlu1 %1600 }
 0xb64   :  { %v1612_v25 = vsub.f32 %v1590_v53, %v1608_v28  ;;  %v1609_v57 = vmul.f32 0.03125, %v1601_v49 }
 0xb65   :  { %v1604_v33 = vpop.xlane.xlu0 %1603 }
 0xb66   :  { %v1613_v61 = vsub.f32 %v1591_v48, %v1609_v57  ;;  %v1610_v39 = vmul.f32 0.03125, %v1604_v33  ;;  %v1616_v60 = vmul.f32 %v1612_v25, %v1612_v25 }
 0xb67   :  { %v1607_v0 = vpop.xlane.xlu1 %1606 }
 0xb68   :  { %v1614_v1 = vsub.f32 %v1592_v50, %v1610_v39  ;;  %v1611_v2 = vmul.f32 0.03125, %v1607_v0  ;;  %v1620_v40 = vsel %vm99_vm0, %v1616_v60, 0.0  ;;  %v1617_v3 = vmul.f32 %v1613_v61, %v1613_v61 }
 0xb69   :  { %1621 = vadd.xlane.f32.xlu0 %v1620_v40 }
 0xb6a   :  { %v1615_v4 = vsub.f32 %v1593_v54, %v1611_v2  ;;  %v1623_v6 = vsel %vm99_vm0, %v1617_v3, 0.0  ;;  %v1618_v8 = vmul.f32 %v1614_v1, %v1614_v1 }
 0xb6b   :  { %1624 = vadd.xlane.f32.xlu1 %v1623_v6 }
 0xb6c   :  { %v1626_v12 = vsel %vm99_vm0, %v1618_v8, 0.0  ;;  %v1619_v11 = vmul.f32 %v1615_v4, %v1615_v4 }
 0xb6d   :  { %1627 = vadd.xlane.f32.xlu0 %v1626_v12 }
 0xb6e   :  { %v1629_v10 = vsel %vm99_vm0, %v1619_v11, 0.0 }
 0xb6f   :  { %1630 = vadd.xlane.f32.xlu1 %v1629_v10 }
 0xbf6   :  { %v1622_v9 = vpop.xlane.xlu0 %1621 }
 0xbf7   :  { %v1632_v14 = vmul.f32 0.03125, %v1622_v9 }
 0xbf8   :  { %v1625_v15 = vpop.xlane.xlu1 %1624 }
 0xbf9   :  { %v1636_v16 = vadd.f32 1e-12, %v1632_v14  ;;  %v1633_v17 = vmul.f32 0.03125, %v1625_v15 }
 0xbfa   :  { %v1628_v18 = vpop.xlane.xlu0 %1627 }
 0xbfb   :  { %3758 = vrsqrt.f32 %v1636_v16  ;;  %v1637_v13 = vadd.f32 1e-12, %v1633_v17  ;;  %v1634_v20 = vmul.f32 0.03125, %v1628_v18 }
 0xbfc   :  { %v1631_v23 = vpop.xlane.xlu1 %1630 }
 0xbfd   :  { %3760 = vrsqrt.f32 %v1637_v13  ;;  %v1638_v24 = vadd.f32 1e-12, %v1634_v20  ;;  %v1635_v21 = vmul.f32 0.03125, %v1631_v23 }
 0xbff   :  { %3762 = vrsqrt.f32 %v1638_v24  ;;  %v1639_v5 = vadd.f32 1e-12, %v1635_v21 }
 0xc01   :  { %3764 = vrsqrt.f32 %v1639_v5 }
 0xc05   :  { %v3759_v27 = vpop.eup %3758 }
 0xc06   :  { %v1644_v30 = vmul.f32 %v3759_v27, %v1612_v25 }
 0xc07   :  { %v3761_v22 = vpop.eup %3760 }
 0xc08   :  { %v1645_v31 = vmul.f32 %v3761_v22, %v1613_v61  ;;  %v1654_v32 = vmul.f32 %v3198_v29, %v1644_v30 }
 0xc09   :  { %v3763_v34 = vpop.eup %3762 }
 0xc0a   :  { %v1646_v36 = vmul.f32 %v3763_v34, %v1614_v1  ;;  %v1655_v37 = vmul.f32 %v3198_v29, %v1645_v31  ;;  %v4412_v43 = vadd.f32 %v3199_v35, %v1654_v32 }
 0xc0b   :  { %v3765_v38 = vpop.eup %3764 }
 0xc0c   :  { %v1656_v41 = vmul.f32 %v3198_v29, %v1646_v36  ;;  %v1647_v42 = vmul.f32 %v3765_v38, %v1615_v4  ;;  %v4414_v44 = vadd.f32 %v3199_v35, %v1655_v37 }
 0xc0e   :  { %v1657_v45 = vmul.f32 %v3198_v29, %v1647_v42  ;;  %v1668_v46 = vpack.c.bf16 %v4414_v44, %v4412_v43  ;;  %v4419_v53 = vadd.f32 %v3199_v35, %v1656_v41 }
 0xc10   :  { %3502 = vmatprep.mubr.msk.bf16.mxu0 %vm99_vm0, %v1668_v46  ;;  %v4421_v47 = vadd.f32 %v3199_v35, %v1657_v45 }
 0xc12   :  { %v1669_v48 = vpack.c.bf16 %v4421_v47, %v4419_v53 }
 0xc14   :  { %3503 = vmatmul.mubr.msk.bf16.vlgmr.msra.gmra.mrb[36].mxu0 %vm99_vm0, %v1669_v48 }
 0xc15   :  { %3508 = vmatprep.mubr.msk.bf16.mxu0 %vm3922_vm1, %v3921_v62 }
 0xce7   :  { %v3504_v50 = vpop.f32.mrb[36].mxu0 }
 0xce8   :  { %v1735_v54 = vpop.f32.mrb[37].mxu0  ;;  %v1744_v59 = vadd.f32 %v3504_v50, %v3205_v51 }
 0xce9   :  { %v3505_v52 = vpop.f32.mrb[38].mxu0  ;;  %v1736_v49 = vadd.f32 %v3205_v51, %v1735_v54 }
 0xcea   :  { %v1747_v56 = vadd.f32 %v3505_v52, %v3205_v51  ;;  %v1738_v28 = vpop.f32.mrb[39].mxu0  ;;  %v4435_v39 = vpack.c.bf16 %v1744_v59, %v1744_v59 }
 0xceb   :  { %v1739_v25 = vadd.f32 %v3205_v51, %v1738_v28  ;;  %v4433_v61 = vpack.c.bf16 %v1736_v49, %v1736_v49 }
 0xcec   :  { %v3667_v57 = vpack.i.bf16 %v1747_v56, %v1744_v59  ;;  %v4445_v0 = vpack.c.bf16 %v1747_v56, %v1747_v56 }
 0xced   :  { %v3662_v33 = vpack.i.bf16 %v1739_v25, %v1736_v49  ;;  %v4441_v60 = vpack.c.bf16 %v1739_v25, %v1739_v25 }
 0xcee   :  { %3668 = vrot.lane.b32.xlu1 %v3667_v57, %s3923_s29 }
 0xcef   :  { %3663 = vrot.lane.b32.xlu0 %v3662_v33, %s3923_s29 }
 0xcf2   :  { %1775 = vrot.lane.b32.xlu1 %v4433_v61, %s3924_s30 }
 0xcf3   :  { %1873 = vrot.lane.b32.xlu0 %v4435_v39, %s3924_s30 }
 0xcf6   :  { %1824 = vrot.lane.b32.xlu1 %v4441_v60, %s3924_s30 }
 0xcfa   :  { %1922 = vrot.lane.b32.xlu1 %v4445_v0, %s3924_s30 }
 0xd60   :  { %v3669_v1 = vpop.permute.xlu1 %3668 }
 0xd61   :  { %v3664_v2 = vpop.permute.xlu0 %3663  ;;  %v3671_v4 = vunpack.i.h.bf16 %v3669_v1  ;;  %v3670_v6 = vunpack.i.l.bf16 %v3669_v1 }
 0xd62   :  { %v3666_v40 = vunpack.i.h.bf16 %v3664_v2  ;;  %v3665_v3 = vunpack.i.l.bf16 %v3664_v2 }
 0xd63   :  { %v4458_v58 = vpack.c.bf16 %v3671_v4, %v3671_v4  ;;  %v4460_v26 = vpack.c.bf16 %v3670_v6, %v3670_v6 }
 0xd64   :  { %v4449_v8 = vpack.c.bf16 %v3666_v40, %v3666_v40  ;;  %v4451_v12 = vpack.c.bf16 %v3665_v3, %v3665_v3  ;;  %v1776_v11 = vpop.permute.xlu1 %1775 }
 0xd65   :  { %v1781_v10 = vsel %vm327_vm2, %v1776_v11, 0  ;;  %v1874_v15 = vpop.permute.xlu0 %1873 }
 0xd66   :  { %1971 = vrot.lane.b32.xlu0 %v4451_v12, %s3924_s30  ;;  %2020 = vrot.lane.b32.xlu1 %v4449_v8, %s3924_s30  ;;  %v1879_v16 = vsel %vm327_vm2, %v1874_v15, 0 }
 0xd67   :  { %3507 = vmatpush3.bf16.xpose.msra.mxu0 %v1781_v10 }
 0xd68   :  { %v1825_v9 = vpop.permute.xlu1 %1824  ;;  %3518 = vmatprep.subr.bf16.mxu0 %v3921_v62 }
 0xd69   :  { %v1830_v14 = vsel %vm327_vm2, %v1825_v9, 0 }
 0xd6a   :  { %2069 = vrot.lane.b32.xlu0 %v4460_v26, %s3924_s30  ;;  %2118 = vrot.lane.b32.xlu1 %v4458_v58, %s3924_s30 }
 0xd6b   :  { %3513 = vmatpush3.bf16.xpose.msra.mxu1 %v1830_v14 }
 0xd6c   :  { %3524 = vmatprep.subr.bf16.mxu1 %v3921_v62  ;;  %v1923_v17 = vpop.permute.xlu1 %1922 }
 0xd6d   :  { %v1928_v18 = vsel %vm327_vm2, %v1923_v17, 0 }
 0xd6e   :  { %3509 = vmatmul.mubr.msk.bf16.vlgmr.msra.gmra.mrb[40].mxu0 %vm327_vm2, %v4433_v61 }
 0xd6f   :  { %3519 = vmatpush3.bf16.xpose.msra.mxu0 %v1879_v16  ;;  %3520 = vmatprep.mubr.msk.bf16.mxu0 %vm3922_vm1, %v3921_v62 }
 0xd70   :  { %3530 = vmatprep.subr.bf16.mxu0 %v3921_v62 }
 0xd72   :  { %3515 = vmatmul.mubr.msk.bf16.vlgmr.msra.gmra.mrb[44].mxu1 %vm327_vm2, %v4441_v60 }
 0xd73   :  { %3525 = vmatpush3.bf16.xpose.msra.mxu1 %v1928_v18  ;;  %3526 = vmatprep.mubr.msk.bf16.mxu1 %vm3922_vm1, %v3921_v62 }
 0xd74   :  { %3536 = vmatprep.subr.bf16.mxu1 %v3921_v62 }
 0xd76   :  { %3521 = vmatmul.mubr.msk.bf16.vlgmr.msra.gmra.mrb[44].mxu0 %vm327_vm2, %v4435_v39 }
 0xd77   :  { %3532 = vmatprep.mubr.msk.bf16.mxu0 %vm3922_vm1, %v3921_v62 }
 0xd7a   :  { %3527 = vmatmul.mubr.msk.bf16.vlgmr.msra.gmra.mrb[48].mxu1 %vm327_vm2, %v4445_v0 }
 0xd7b   :  { %3538 = vmatprep.mubr.msk.bf16.mxu1 %vm3922_vm1, %v3921_v62 }
 0xdd8   :  { %v1972_v13 = vpop.permute.xlu0 %1971  ;;  %v2021_v20 = vpop.permute.xlu1 %2020 }
 0xdd9   :  { %v1977_v23 = vsel %vm327_vm2, %v1972_v13, 0  ;;  %v2026_v24 = vsel %vm327_vm2, %v2021_v20, 0 }
 0xdda   :  { %3531 = vmatpush3.bf16.xpose.msra.mxu0 %v1977_v23  ;;  %3537 = vmatpush3.bf16.xpose.msra.mxu1 %v2026_v24 }
 0xddb   :  { %3542 = vmatprep.subr.bf16.mxu0 %v3921_v62  ;;  %3548 = vmatprep.subr.bf16.mxu1 %v3921_v62 }
 0xddc   :  { %v2070_v21 = vpop.permute.xlu0 %2069  ;;  %v2119_v5 = vpop.permute.xlu1 %2118 }
 0xddd   :  { %v2075_v27 = vsel %vm327_vm2, %v2070_v21, 0  ;;  %v2124_v29 = vsel %vm327_vm2, %v2119_v5, 0 }
 0xde1   :  { %3533 = vmatmul.mubr.msk.bf16.vlgmr.msra.gmra.mrb[48].mxu0 %vm327_vm2, %v4451_v12  ;;  %3539 = vmatmul.mubr.msk.bf16.vlgmr.msra.gmra.mrb[52].mxu1 %vm327_vm2, %v4449_v8 }
 0xde2   :  { %3543 = vmatpush3.bf16.xpose.msra.mxu0 %v2075_v27  ;;  %3549 = vmatpush3.bf16.xpose.msra.mxu1 %v2124_v29 }
 0xde3   :  { %3544 = vmatprep.mubr.msk.bf16.mxu0 %vm3922_vm1, %v3921_v62  ;;  %3550 = vmatprep.mubr.msk.bf16.mxu1 %vm3922_vm1, %v3921_v62 }
 0xde4   :  { %3560 = vmatprep.subr.bf16.mxu1 %v3921_v62  ;;  %3554 = vmatprep.subr.bf16.mxu0 %v3921_v62 }
 0xde9   :  { %3545 = vmatmul.mubr.msk.bf16.vlgmr.msra.gmra.mrb[52].mxu0 %vm327_vm2, %v4460_v26  ;;  %3551 = vmatmul.mubr.msk.bf16.vlgmr.msra.gmra.mrb[56].mxu1 %vm327_vm2, %v4458_v58 }
 0xdea   :  { %3556 = vmatprep.mubr.msk.bf16.mxu0 %vm3922_vm1, %v3921_v62  ;;  %3562 = vmatprep.mubr.msk.bf16.mxu1 %vm3922_vm1, %v3921_v62 }
 0xe41   :  { %v1817_v30 = vpop.f32.mrb[40].mxu0 }
 0xe42   :  { %v1818_v22 = vadd.f32 %v1817_v30, %v4185_v55  ;;  %v3510_v31 = vpop.f32.mrb[41].mxu0 }
 0xe43   :  { %v1820_v32 = vpop.f32.mrb[42].mxu0 }
 0xe44   :  { %v3511_v34 = vpop.f32.mrb[43].mxu0  ;;  %v2166_v35 = vsel %vm717_vm3, %v1818_v22, -inf }
 0xe45   :  { %2167 = vmax.xlane.f32.xlu0 %v2166_v35  ;;  %v1866_v36 = vpop.f32.mrb[44].mxu1 }
 0xe46   :  { %v4516_v37 = vadd.f32 %v1866_v36, %v4190_v63  ;;  %v3516_v38 = vpop.f32.mrb[45].mxu1 }
 0xe47   :  { %v1869_v41 = vpop.f32.mrb[46].mxu1 }
 0xe48   :  { %v3517_v42 = vpop.f32.mrb[47].mxu1  ;;  %v2169_v45 = vsel %vm717_vm3, %v4516_v37, -inf }
 0xe49   :  { %v1915_v46 = vpop.f32.mrb[44].mxu0  ;;  %2170 = vmax.xlane.f32.xlu1 %v2169_v45 }
 0xe4a   :  { %v1916_v48 = vadd.f32 %v1915_v46, %v4197_v7  ;;  %v3522_v50 = vpop.f32.mrb[45].mxu0 }
 0xe4b   :  { %v1918_v51 = vpop.f32.mrb[46].mxu0 }
 0xe4c   :  { %v3523_v54 = vpop.f32.mrb[47].mxu0  ;;  %v2172_v52 = vsel %vm717_vm3, %v1916_v48, -inf }
 0xe4d   :  { %2173 = vmax.xlane.f32.xlu0 %v2172_v52  ;;  %v1964_v59 = vpop.f32.mrb[48].mxu1 }
 0xe4e   :  { %v4523_v56 = vadd.f32 %v1964_v59, %v4202_v19  ;;  %v3528_v28 = vpop.f32.mrb[49].mxu1 }
 0xe4f   :  { %v1967_v49 = vpop.f32.mrb[50].mxu1 }
 0xe50   :  { %v3529_v25 = vpop.f32.mrb[51].mxu1  ;;  %v2175_v57 = vsel %vm717_vm3, %v4523_v56, -inf }
 0xe51   :  { %2176 = vmax.xlane.f32.xlu0 %v2175_v57 }
 0xeb4   :  { %v2013_v33 = vpop.f32.mrb[48].mxu0  ;;  %v2062_v1 = vpop.f32.mrb[52].mxu1 }
 0xeb5   :  { %v2014_v2 = vadd.f32 %v2013_v33, %v4185_v55  ;;  %v4529_v40 = vadd.f32 %v2062_v1, %v4190_v63  ;;  %v3534_v3 = vpop.f32.mrb[49].mxu0  ;;  %v3540_v4 = vpop.f32.mrb[53].mxu1 }
 0xeb6   :  { %v2016_v6 = vpop.f32.mrb[50].mxu0  ;;  %v2065_v11 = vpop.f32.mrb[54].mxu1 }
 0xeb7   :  { %v3535_v10 = vpop.f32.mrb[51].mxu0  ;;  %v3541_v9 = vpop.f32.mrb[55].mxu1  ;;  %v2178_v14 = vsel %vm717_vm3, %v2014_v2, -inf  ;;  %v2181_v15 = vsel %vm717_vm3, %v4529_v40, -inf }
 0xeb8   :  { %2179 = vmax.xlane.f32.xlu0 %v2178_v14  ;;  %2182 = vmax.xlane.f32.xlu1 %v2181_v15 }
 0xebc   :  { %v2111_v16 = vpop.f32.mrb[52].mxu0  ;;  %v2160_v17 = vpop.f32.mrb[56].mxu1 }
 0xebd   :  { %v2112_v55 = vadd.f32 %v2111_v16, %v4197_v7  ;;  %v3546_v18 = vpop.f32.mrb[53].mxu0  ;;  %v3552_v63 = vpop.f32.mrb[57].mxu1  ;;  %v2161_v32 = vadd.f32 %v2160_v17, %v4202_v19 }
 0xebe   :  { %v2114_v13 = vpop.f32.mrb[54].mxu0  ;;  %v2163_v20 = vpop.f32.mrb[58].mxu1 }
 0xebf   :  { %v3547_v23 = vpop.f32.mrb[55].mxu0  ;;  %v3553_v24 = vpop.f32.mrb[59].mxu1  ;;  %v2184_v21 = vsel %vm717_vm3, %v2112_v55, -inf  ;;  %v2187_v34 = vsel %vm717_vm3, %v2161_v32, -inf }
 0xec0   :  { %2185 = vmax.xlane.f32.xlu0 %v2184_v21 }
 0xec9   :  { %2310 = vrot.lane.b32.xlu1 %v4441_v60, %s3919_s1 }
 0xecd   :  { %2358 = vrot.lane.b32.xlu1 %v4435_v39, %s3919_s1 }
 0xed2   :  { %v2168_v5 = vpop.xlane.xlu0 %2167 }
 0xed3   :  { %v2190_v7 = vsub.f32 %v1818_v22, %v2168_v5 }
 0xed5   :  { %v2198_v29 = vmul.f32 1.442695, %v2190_v7 }
 0xed6   :  { %2262 = vrot.lane.b32.xlu0 %v4433_v61, %s3919_s1  ;;  %v2171_v22 = vpop.xlane.xlu1 %2170 }
 0xed7   :  { %3766 = vpow2.f32 %v2198_v29  ;;  %v2191_v19 = vsub.f32 %v4516_v37, %v2171_v22 }
 0xed9   :  { %v2200_v36 = vmul.f32 1.442695, %v2191_v19 }
 0xeda   :  { %v2174_v27 = vpop.xlane.xlu0 %2173 }
 0xedb   :  { %v2192_v30 = vsub.f32 %v1916_v48, %v2174_v27 }
 0xedd   :  { %v2202_v31 = vmul.f32 1.442695, %v2192_v30 }
 0xede   :  { %v2177_v42 = vpop.xlane.xlu0 %2176 }
 0xedf   :  { %3768 = vpow2.f32 %v2202_v31 }
 0xee0   :  { %3770 = vpow2.f32 %v2200_v36 }
 0xee1   :  { %v4544_v35 = vpop.eup %3766 }
 0xee2   :  { %v2214_v39 = vsel %vm717_vm3, %v4544_v35, 0.0 }
 0xee9   :  { %v4548_v60 = vpop.eup %3768 }
 0xeea   :  { %v2220_v61 = vsel %vm717_vm3, %v4548_v60, 0.0  ;;  %v4557_v38 = vpop.eup %3770 }
 0xeeb   :  { %v2217_v41 = vsel %vm717_vm3, %v4557_v38, 0.0 }
 0xef1   :  { %2188 = vmax.xlane.f32.xlu1 %v2187_v34 }
 0xef5   :  { %2215 = vadd.xlane.f32.xlu0 %v2214_v39 }
 0xef9   :  { %2221 = vadd.xlane.f32.xlu0 %v2220_v61 }
 0xf02   :  { %2406 = vrot.lane.b32.xlu1 %v4445_v0, %s3919_s1  ;;  %v2193_v0 = vsub.f32 %v4523_v56, %v2177_v42 }
 0xf04   :  { %v2204_v50 = vmul.f32 1.442695, %v2193_v0 }
 0xf0f   :  { %2454 = vrot.lane.b32.xlu0 %v4451_v12, %s3919_s1 }
 0xf26   :  { %2218 = vadd.xlane.f32.xlu1 %v2217_v41 }
 0xf37   :  { %2502 = vrot.lane.b32.xlu1 %v4449_v8, %s3919_s1 }
 0xf45   :  { %v2180_v45 = vpop.xlane.xlu0 %2179  ;;  %v2183_v46 = vpop.xlane.xlu1 %2182 }
 0xf46   :  { %v2194_v48 = vsub.f32 %v2014_v2, %v2180_v45  ;;  %v2195_v37 = vsub.f32 %v4529_v40, %v2183_v46 }
 0xf48   :  { %v2206_v12 = vmul.f32 1.442695, %v2194_v48  ;;  %v2208_v52 = vmul.f32 1.442695, %v2195_v37 }
 0xf49   :  { %v2311_v51 = vpop.permute.xlu1 %2310 }
 0xf4a   :  { %3772 = vpow2.f32 %v2206_v12  ;;  %v2316_v54 = vsel %vm819_vm4, %v2311_v51, 0 }
 0xf4b   :  { %3561 = vmatpush3.bf16.msra.mxu1 %v2316_v54  ;;  %3774 = vpow2.f32 %v2204_v50 }
 0xf4c   :  { %3572 = vmatprep.subr.bf16.mxu1 %v3921_v62  ;;  %3776 = vpow2.f32 %v2208_v52 }
 0xf4d   :  { %v2186_v8 = vpop.xlane.xlu0 %2185  ;;  %v2359_v6 = vpop.permute.xlu1 %2358 }
 0xf4e   :  { %v2196_v59 = vsub.f32 %v2112_v55, %v2186_v8  ;;  %v2364_v13 = vsel %vm819_vm4, %v2359_v6, 0 }
 0xf50   :  { %v2210_v28 = vmul.f32 1.442695, %v2196_v59 }
 0xf51   :  { %v2263_v56 = vpop.permute.xlu0 %2262 }
 0xf52   :  { %3778 = vpow2.f32 %v2210_v28  ;;  %v2268_v49 = vsel %vm819_vm4, %v2263_v56, 0 }
 0xf53   :  { %3555 = vmatpush3.bf16.msra.mxu0 %v2268_v49 }
 0xf54   :  { %v4568_v25 = vpop.eup %3772  ;;  %3566 = vmatprep.subr.bf16.mxu0 %v3921_v62 }
 0xf55   :  { %v2226_v57 = vsel %vm717_vm3, %v4568_v25, 0.0  ;;  %v4573_v33 = vpop.eup %3774 }
 0xf56   :  { %2227 = vadd.xlane.f32.xlu0 %v2226_v57  ;;  %v2223_v1 = vsel %vm717_vm3, %v4573_v33, 0.0  ;;  %v4577_v2 = vpop.eup %3776 }
 0xf57   :  { %v2229_v4 = vsel %vm717_vm3, %v4577_v2, 0.0 }
 0xf5b   :  { %2224 = vadd.xlane.f32.xlu1 %v2223_v1 }
 0xf5c   :  { %v4579_v40 = vpop.eup %3778 }
 0xf5d   :  { %v2232_v3 = vsel %vm717_vm3, %v4579_v40, 0.0 }
 0xf5e   :  { %2233 = vadd.xlane.f32.xlu0 %v2232_v3 }
 0xf5f   :  { %2230 = vadd.xlane.f32.xlu1 %v2229_v4 }
 0xf74   :  { %2550 = vrot.lane.b32.xlu0 %v4460_v26, %s3919_s1 }
 0xf7e   :  { %v2189_v11 = vpop.xlane.xlu1 %2188 }
 0xf7f   :  { %v2197_v10 = vsub.f32 %v2161_v32, %v2189_v11 }
 0xf81   :  { %v2212_v9 = vmul.f32 1.442695, %v2197_v10 }
 0xf82   :  { %v2216_v14 = vpop.xlane.xlu0 %2215  ;;  %v2407_v5 = vpop.permute.xlu1 %2406 }
 0xf83   :  { %3780 = vpow2.f32 %v2212_v9  ;;  %v2412_v31 = vsel %vm819_vm4, %v2407_v5, 0 }
 0xf84   :  { %3782 = vrcp.f32 %v2216_v14 }
 0xf86   :  { %v2222_v15 = vpop.xlane.xlu0 %2221 }
 0xf87   :  { %3784 = vrcp.f32 %v2222_v15 }
 0xf8a   :  { %v2455_v23 = vpop.permute.xlu0 %2454 }
 0xf8b   :  { %v2460_v21 = vsel %vm819_vm4, %v2455_v23, 0 }
 0xf8d   :  { %v4587_v16 = vpop.eup %3780 }
 0xf8e   :  { %v3783_v17 = vpop.eup %3782  ;;  %v2235_v55 = vsel %vm717_vm3, %v4587_v16, 0.0 }
 0xf8f   :  { %v2246_v18 = vmul.f32 %v3783_v17, %v4544_v35  ;;  %2236 = vadd.xlane.f32.xlu1 %v2235_v55 }
 0xf91   :  { %v2254_v63 = vpack.c.bf16 %v2246_v18, %v2246_v18  ;;  %v3785_v26 = vpop.eup %3784 }
 0xf92   :  { %v2248_v20 = vmul.f32 %v3785_v26, %v4548_v60 }
 0xf93   :  { %3557 = vmatmul.mubr.msk.bf16.vlgmr.msra.gmra.mrb[56].mxu0 %vm717_vm3, %v2254_v63  ;;  %v3694_v63 = vld [vmem:[%s4736_s6 + $0x10] sm:$0xff]  }
 0xf94   :  { %3567 = vmatpush3.bf16.msra.mxu0 %v2364_v13  ;;  %3568 = vmatprep.mubr.msk.bf16.mxu0 %vm3922_vm1, %v3921_v62  ;;  %v2256_v24 = vpack.c.bf16 %v2248_v20, %v2248_v20 }
 0xf95   :  { %3578 = vmatprep.subr.bf16.mxu0 %v3921_v62 }
 0xf9b   :  { %3569 = vmatmul.mubr.msk.bf16.vlgmr.msra.gmra.mrb[60].mxu0 %vm717_vm3, %v2256_v24 }
 0xf9c   :  { %3579 = vmatpush3.bf16.msra.mxu0 %v2460_v21  ;;  %3580 = vmatprep.mubr.msk.bf16.mxu0 %vm3922_vm1, %v3921_v62 }
 0xf9d   :  { %3590 = vmatprep.subr.bf16.mxu0 %v3921_v62 }
 0xfa0   :  { %2598 = vrot.lane.b32.xlu1 %v4458_v58, %s3919_s1 }
 0xfb3   :  { %v2219_v7 = vpop.xlane.xlu1 %2218 }
 0xfb4   :  { %3786 = vrcp.f32 %v2219_v7 }
 0xfb7   :  { %v2503_v34 = vpop.permute.xlu1 %2502 }
 0xfb8   :  { %v2508_v48 = vsel %vm819_vm4, %v2503_v34, 0 }
 0xfbe   :  { %v3787_v27 = vpop.eup %3786 }
 0xfbf   :  { %v2247_v29 = vmul.f32 %v3787_v27, %v4557_v38  ;;  %v3695_v27 = vld [vmem:[%s4736_s6 + $0x18] sm:$0xff]  }
 0xfc1   :  { %v2255_v30 = vpack.c.bf16 %v2247_v29, %v2247_v29 }
 0xfc3   :  { %3563 = vmatmul.mubr.msk.bf16.vlgmr.msra.gmra.mrb[60].mxu1 %vm717_vm3, %v2255_v30 }
 0xfc4   :  { %3573 = vmatpush3.bf16.msra.mxu1 %v2412_v31  ;;  %3574 = vmatprep.mubr.msk.bf16.mxu1 %vm3922_vm1, %v3921_v62 }
 0xfc5   :  { %3584 = vmatprep.subr.bf16.mxu1 %v3921_v62 }
 0xfe3   :  { %v2228_v32 = vpop.xlane.xlu0 %2227 }
 0xfe4   :  { %3788 = vrcp.f32 %v2228_v32 }
 0xfe8   :  { %v2225_v58 = vpop.xlane.xlu1 %2224 }
 0xfe9   :  { %3790 = vrcp.f32 %v2225_v58 }
 0xfeb   :  { %v2234_v35 = vpop.xlane.xlu0 %2233 }
 0xfec   :  { %3792 = vrcp.f32 %v2234_v35  ;;  %v2231_v39 = vpop.xlane.xlu1 %2230 }
 0xfed   :  { %3794 = vrcp.f32 %v2231_v39 }
 0xfee   :  { %v3789_v60 = vpop.eup %3788 }
 0xfef   :  { %v2250_v61 = vmul.f32 %v3789_v60, %v4568_v25  ;;  %v2551_v22 = vpop.permute.xlu0 %2550 }
 0xff0   :  { %v2556_v38 = vsel %vm819_vm4, %v2551_v22, 0 }
 0xff1   :  { %v2258_v19 = vpack.c.bf16 %v2250_v61, %v2250_v61 }
 0xff3   :  { %v3791_v36 = vpop.eup %3790  ;;  %3581 = vmatmul.mubr.msk.bf16.vlgmr.msra.gmra.mrb[64].mxu0 %vm717_vm3, %v2258_v19 }
 0xff4   :  { %v2249_v41 = vmul.f32 %v3791_v36, %v4573_v33  ;;  %3591 = vmatpush3.bf16.msra.mxu0 %v2556_v38  ;;  %3592 = vmatprep.mubr.msk.bf16.mxu0 %vm3922_vm1, %v3921_v62 }
 0xff5   :  { %3602 = vmatprep.subr.bf16.mxu0 %v3694_v63 }
 0xff6   :  { %v3793_v42 = vpop.eup %3792  ;;  %v2257_v0 = vpack.c.bf16 %v2249_v41, %v2249_v41 }
 0xff7   :  { %v3795_v45 = vpop.eup %3794  ;;  %v2252_v46 = vmul.f32 %v3793_v42, %v4579_v40 }
 0xff8   :  { %3575 = vmatmul.mubr.msk.bf16.vlgmr.msra.gmra.mrb[64].mxu1 %vm717_vm3, %v2257_v0  ;;  %v2251_v50 = vmul.f32 %v3795_v45, %v4577_v2  ;;  %v3231_v45 = vld [vmem:[%s4737_s7 + $0x1] ss:$0 sm:$0xff] }
 0xff9   :  { %3585 = vmatpush3.bf16.msra.mxu1 %v2508_v48  ;;  %v2260_v12 = vpack.c.bf16 %v2252_v46, %v2252_v46  ;;  %3586 = vmatprep.mubr.msk.bf16.mxu1 %vm3922_vm1, %v3921_v62 }
 0xffa   :  { %3596 = vmatprep.subr.bf16.mxu1 %v3921_v62  ;;  %v2259_v37 = vpack.c.bf16 %v2251_v50, %v2251_v50 }
 0xffb   :  { %3593 = vmatmul.mubr.msk.bf16.vlgmr.msra.gmra.mrb[68].mxu0 %vm717_vm3, %v2260_v12 }
 0xffc   :  { %3603 = vmatpush3.bf16.msra.mxu0 %v3694_v63  ;;  %v3696_v63 = vld [vmem:[#allocation7 + $0x10] sm:$0xff]  }
 0xffd   :  { %3604 = vmatprep.subr.bf16.mxu0 %v3695_v27 }
0x1000   :  { %3587 = vmatmul.mubr.msk.bf16.vlgmr.msra.gmra.mrb[68].mxu1 %vm717_vm3, %v2259_v37  ;;  %3605 = vmatpush3.bf16.msra.mxu0 %v3695_v27 }
0x1001   :  { %3598 = vmatprep.mubr.msk.bf16.mxu1 %vm3922_vm1, %v3921_v62 }
0x101c   :  { %v2237_v51 = vpop.xlane.xlu1 %2236 }
0x101d   :  { %3796 = vrcp.f32 %v2237_v51 }
0x1020   :  { %v2599_v54 = vpop.permute.xlu1 %2598 }
0x1021   :  { %v2604_v52 = vsel %vm819_vm4, %v2599_v54, 0 }
0x1022   :  { %3597 = vmatpush3.bf16.msra.mxu1 %v2604_v52 }
0x1023   :  { %3610 = vmatprep.subr.bf16.mxu1 %v3696_v63 }
0x1027   :  { %v3797_v8 = vpop.eup %3796 }
0x1028   :  { %v2253_v59 = vmul.f32 %v3797_v8, %v4587_v16 }
0x102a   :  { %v2261_v28 = vpack.c.bf16 %v2253_v59, %v2253_v59 }
0x102c   :  { %3599 = vmatmul.mubr.msk.bf16.vlgmr.msra.gmra.mrb[72].mxu1 %vm717_vm3, %v2261_v28 }
0x102d   :  { %3611 = vmatpush3.bf16.msra.mxu1 %v3696_v63 }
0x1066   :  { %v2304_v56 = vpop.f32.mrb[56].mxu0 }
0x1067   :  { %v3558_v49 = vpop.f32.mrb[57].mxu0 }
0x1068   :  { %v2307_v25 = vpop.f32.mrb[58].mxu0 }
0x1069   :  { %v3559_v57 = vpop.f32.mrb[59].mxu0 }
0x106e   :  { %v2400_v33 = vpop.f32.mrb[60].mxu0 }
0x106f   :  { %v3570_v1 = vpop.f32.mrb[61].mxu0 }
0x1070   :  { %v2403_v2 = vpop.f32.mrb[62].mxu0 }
0x1071   :  { %v3571_v62 = vpop.f32.mrb[63].mxu0 }
0x1096   :  { %v2352_v40 = vpop.f32.mrb[60].mxu1 }
0x1097   :  { %v3564_v3 = vpop.f32.mrb[61].mxu1 }
0x1098   :  { %v2355_v4 = vpop.f32.mrb[62].mxu1 }
0x1099   :  { %v3565_v6 = vpop.f32.mrb[63].mxu1 }
0x10c6   :  { %v2496_v11 = vpop.f32.mrb[64].mxu0 }
0x10c7   :  { %v3582_v10 = vpop.f32.mrb[65].mxu0 }
0x10c8   :  { %v2499_v9 = vpop.f32.mrb[66].mxu0 }
0x10c9   :  { %v3583_v14 = vpop.f32.mrb[67].mxu0 }
0x10cb   :  { %v2448_v15 = vpop.f32.mrb[64].mxu1 }
0x10cc   :  { %v3576_v16 = vpop.f32.mrb[65].mxu1 }
0x10cd   :  { %v2451_v17 = vpop.f32.mrb[66].mxu1 }
0x10ce   :  { %v3577_v55 = vpop.f32.mrb[67].mxu1  ;;  %v2592_v18 = vpop.f32.mrb[68].mxu0 }
0x10cf   :  { %v3594_v26 = vpop.f32.mrb[69].mxu0 }
0x10d0   :  { %v2595_v13 = vpop.f32.mrb[70].mxu0  ;;  %v3697_v26 = vld [vmem:[#allocation7 + $0x18] sm:$0xff]  }
0x10d1   :  { %v3595_v20 = vpop.f32.mrb[71].mxu0  ;;  %3612 = vmatprep.subr.bf16.mxu1 %v3697_v26 }
0x10d2   :  { %3613 = vmatpush3.bf16.msra.mxu1 %v3697_v26 }
0x10d3   :  { %v2544_v23 = vpop.f32.mrb[68].mxu1 }
0x10d4   :  { %v3672_v24 = vpack.i.bf16 %v2544_v23, %v2496_v11  ;;  %v3588_v21 = vpop.f32.mrb[69].mxu1 }
0x10d5   :  { %v2547_v5 = vpop.f32.mrb[70].mxu1 }
0x10d6   :  { %3673 = vrot.lane.b32.xlu0 %v3672_v24, %s3926_s0  ;;  %v3589_v7 = vpop.f32.mrb[71].mxu1 }
0x10ff   :  { %v2640_v29 = vpop.f32.mrb[72].mxu1 }
0x1100   :  { %v3677_v30 = vpack.i.bf16 %v2640_v29, %v2592_v18  ;;  %v3600_v31 = vpop.f32.mrb[73].mxu1 }
0x1101   :  { %v2643_v32 = vpop.f32.mrb[74].mxu1 }
0x1102   :  { %3678 = vrot.lane.b32.xlu1 %v3677_v30, %s3926_s0  ;;  %v3601_v34 = vpop.f32.mrb[75].mxu1 }
0x1148   :  { %v3674_v58 = vpop.permute.xlu0 %3673 }
0x1149   :  { %v3676_v35 = vunpack.i.h.bf16 %v3674_v58  ;;  %v3675_v39 = vunpack.i.l.bf16 %v3674_v58  ;;  %v3238_v58 = vld [vmem:[%s4738_s8 + $0x1] ss:$0 sm:$0xff] }
0x114b   :  { %v2663_v60 = vsel %vm327_vm2, %v2352_v40, %v3676_v35  ;;  %v2662_v61 = vsel %vm327_vm2, %v2304_v56, %v3675_v39 }
0x114c   :  { %v2666_v22 = vpack.c.bf16 %v2663_v60, %v2662_v61 }
0x114e   :  { %3606 = vmatprep.mubr.msk.bf16.mxu0 %vm99_vm0, %v2666_v22 }
0x1174   :  { %v3679_v19 = vpop.permute.xlu1 %3678 }
0x1175   :  { %v3681_v36 = vunpack.i.h.bf16 %v3679_v19  ;;  %v3680_v38 = vunpack.i.l.bf16 %v3679_v19  ;;  %v3239_v19 = vld [vmem:[%s4739_s9 + $0x1] ss:$0 sm:$0xff] }
0x1177   :  { %v2665_v41 = vsel %vm327_vm2, %v2448_v15, %v3681_v36  ;;  %v2664_v42 = vsel %vm327_vm2, %v2400_v33, %v3680_v38 }
0x1178   :  { %v2667_v0 = vpack.c.bf16 %v2665_v41, %v2664_v42 }
0x117a   :  { %3607 = vmatmul.mubr.msk.bf16.vlgmr.msra.gmra.mrb[72].mxu0 %vm99_vm0, %v2667_v0 }
0x124d   :  { %v3608_v46 = vpop.f32.mrb[72].mxu0 }
0x124e   :  { %v2733_v48 = vpop.f32.mrb[73].mxu0  ;;  %v2742_v12 = vadd.f32 %v3608_v46, %v3231_v45 }
0x124f   :  { %v2734_v50 = vadd.f32 %v3231_v45, %v2733_v48  ;;  %v3609_v37 = vpop.f32.mrb[74].mxu0 }
0x1250   :  { %v2736_v51 = vpop.f32.mrb[75].mxu0  ;;  %v2745_v8 = vadd.f32 %v3609_v37, %v3231_v45  ;;  %v2750_v56 = vadd.f32 %v2742_v12, %v4419_v53 }
0x1251   :  { %v2737_v54 = vadd.f32 %v3231_v45, %v2736_v51  ;;  %v2748_v52 = vadd.f32 %v2734_v50, %v4412_v43 }
0x1252   :  { %v2751_v25 = vadd.f32 %v2745_v8, %v4421_v47  ;;  %v2762_v57 = vsel %vm99_vm0, %v2750_v56, 0.0  ;;  %v3700_v8 = vld [vmem:[%s4742_s12 + $0x30] sm:$0xff]  }
0x1253   :  { %v2749_v59 = vadd.f32 %v2737_v54, %v4414_v44  ;;  %v2756_v28 = vsel %vm99_vm0, %v2748_v52, 0.0  ;;  %v3698_v54 = vld [vmem:[%s4742_s12 + $0x20] sm:$0xff]  }
0x1254   :  { %2757 = vadd.xlane.f32.xlu0 %v2756_v28  ;;  %v2765_v33 = vsel %vm99_vm0, %v2751_v25, 0.0  ;;  %3618 = vmatprep.subr.bf16.mxu0 %v3698_v54  ;;  %v3241_v28 = vld [vmem:[%s4741_s11 + $0x1] ss:$0 sm:$0xff] }
0x1255   :  { %v2759_v49 = vsel %vm99_vm0, %v2749_v59, 0.0  ;;  %3619 = vmatpush3.bf16.msra.mxu0 %v3698_v54 }
0x1256   :  { %2760 = vadd.xlane.f32.xlu1 %v2759_v49 }
0x1258   :  { %2763 = vadd.xlane.f32.xlu0 %v2762_v57 }
0x125c   :  { %2766 = vadd.xlane.f32.xlu0 %v2765_v33 }
0x12e1   :  { %v2758_v43 = vpop.xlane.xlu0 %2757 }
0x12e2   :  { %v2768_v1 = vmul.f32 0.03125, %v2758_v43 }
0x12e3   :  { %v2761_v2 = vpop.xlane.xlu1 %2760 }
0x12e4   :  { %v2772_v44 = vsub.f32 %v2748_v52, %v2768_v1  ;;  %v2769_v62 = vmul.f32 0.03125, %v2761_v2  ;;  %v3699_v52 = vld [vmem:[%s4742_s12 + $0x28] sm:$0xff]  }
0x12e5   :  { %v2764_v40 = vpop.xlane.xlu0 %2763  ;;  %3620 = vmatprep.subr.bf16.mxu0 %v3699_v52 }
0x12e6   :  { %v2773_v3 = vsub.f32 %v2749_v59, %v2769_v62  ;;  %v2770_v53 = vmul.f32 0.03125, %v2764_v40  ;;  %v2776_v4 = vmul.f32 %v2772_v44, %v2772_v44  ;;  %3621 = vmatpush3.bf16.msra.mxu0 %v3699_v52  ;;  %v3701_v59 = vld [vmem:[%s4742_s12 + $0x38] sm:$0xff]  }
0x12e7   :  { %3622 = vmatprep.subr.bf16.mxu0 %v3700_v8 }
0x12e8   :  { %v2774_v6 = vsub.f32 %v2750_v56, %v2770_v53  ;;  %v2780_v11 = vsel %vm99_vm0, %v2776_v4, 0.0  ;;  %v2777_v10 = vmul.f32 %v2773_v3, %v2773_v3 }
0x12e9   :  { %2781 = vadd.xlane.f32.xlu0 %v2780_v11  ;;  %v2767_v47 = vpop.xlane.xlu0 %2766 }
0x12ea   :  { %v2771_v9 = vmul.f32 0.03125, %v2767_v47  ;;  %v2783_v14 = vsel %vm99_vm0, %v2777_v10, 0.0  ;;  %v2778_v15 = vmul.f32 %v2774_v6, %v2774_v6  ;;  %3623 = vmatpush3.bf16.msra.mxu0 %v3700_v8 }
0x12eb   :  { %2784 = vadd.xlane.f32.xlu1 %v2783_v14  ;;  %3624 = vmatprep.subr.bf16.mxu0 %v3701_v59 }
0x12ec   :  { %v2775_v16 = vsub.f32 %v2751_v25, %v2771_v9  ;;  %v2786_v17 = vsel %vm99_vm0, %v2778_v15, 0.0 }
0x12ed   :  { %2787 = vadd.xlane.f32.xlu0 %v2786_v17 }
0x12ee   :  { %v2779_v55 = vmul.f32 %v2775_v16, %v2775_v16  ;;  %3625 = vmatpush3.bf16.msra.mxu0 %v3701_v59 }
0x12f0   :  { %v2789_v18 = vsel %vm99_vm0, %v2779_v55, 0.0 }
0x12f1   :  { %2790 = vadd.xlane.f32.xlu1 %v2789_v18 }
0x1376   :  { %v2782_v13 = vpop.xlane.xlu0 %2781 }
0x1377   :  { %v2792_v20 = vmul.f32 0.03125, %v2782_v13 }
0x1378   :  { %v2785_v23 = vpop.xlane.xlu1 %2784 }
0x1379   :  { %v2796_v24 = vadd.f32 1e-12, %v2792_v20  ;;  %v2793_v21 = vmul.f32 0.03125, %v2785_v23 }
0x137a   :  { %v2788_v5 = vpop.xlane.xlu0 %2787 }
0x137b   :  { %3798 = vrsqrt.f32 %v2796_v24  ;;  %v2797_v7 = vadd.f32 1e-12, %v2793_v21  ;;  %v2794_v27 = vmul.f32 0.03125, %v2788_v5 }
0x137d   :  { %3800 = vrsqrt.f32 %v2797_v7  ;;  %v2798_v29 = vadd.f32 1e-12, %v2794_v27 }
0x137e   :  { %v2791_v30 = vpop.xlane.xlu1 %2790 }
0x137f   :  { %3802 = vrsqrt.f32 %v2798_v29  ;;  %v2795_v31 = vmul.f32 0.03125, %v2791_v30 }
0x1381   :  { %v2799_v32 = vadd.f32 1e-12, %v2795_v31 }
0x1383   :  { %3804 = vrsqrt.f32 %v2799_v32 }
0x1385   :  { %v3799_v34 = vpop.eup %3798 }
0x1386   :  { %v2804_v35 = vmul.f32 %v3799_v34, %v2772_v44 }
0x1387   :  { %v3801_v39 = vpop.eup %3800 }
0x1388   :  { %v2805_v60 = vmul.f32 %v3801_v39, %v2773_v3  ;;  %v2814_v61 = vmul.f32 %v3238_v58, %v2804_v35 }
0x1389   :  { %v3803_v22 = vpop.eup %3802 }
0x138a   :  { %v2806_v36 = vmul.f32 %v3803_v22, %v2774_v6  ;;  %v2815_v38 = vmul.f32 %v3238_v58, %v2805_v60  ;;  %v4666_v41 = vadd.f32 %v3239_v19, %v2814_v61 }
0x138c   :  { %v4668_v42 = vadd.f32 %v3239_v19, %v2815_v38  ;;  %v2816_v45 = vmul.f32 %v3238_v58, %v2806_v36 }
0x138d   :  { %v3805_v0 = vpop.eup %3804 }
0x138e   :  { %v2807_v46 = vmul.f32 %v3805_v0, %v2775_v16  ;;  %v2828_v48 = vpack.c.bf16 %v4668_v42, %v4666_v41  ;;  %v4673_v50 = vadd.f32 %v3239_v19, %v2816_v45 }
0x1390   :  { %v2817_v12 = vmul.f32 %v3238_v58, %v2807_v46  ;;  %3614 = vmatprep.mubr.msk.bf16.mxu1 %vm99_vm0, %v2828_v48 }
0x1392   :  { %v4675_v37 = vadd.f32 %v3239_v19, %v2817_v12  ;;  %v3255_v19 = vld [vmem:[%s4743_s13 + $0x1] ss:$0 sm:$0xff] }
0x1394   :  { %v2829_v51 = vpack.c.bf16 %v4675_v37, %v4673_v50 }
0x1396   :  { %3615 = vmatmul.mubr.msk.bf16.vlgmr.msra.gmra.mrb[76].mxu1 %vm99_vm0, %v2829_v51 }
0x1469   :  { %v3616_v56 = vpop.f32.mrb[76].mxu1 }
0x146a   :  { %v2904_v49 = vadd.f32 %v3616_v56, %v3241_v28  ;;  %v2895_v25 = vpop.f32.mrb[77].mxu1 }
0x146b   :  { %v2896_v57 = vadd.f32 %v3241_v28, %v2895_v25  ;;  %v3617_v33 = vpop.f32.mrb[78].mxu1 }
0x146c   :  { %v2916_v43 = vmul.f32 0.044715, %v2904_v49  ;;  %v2907_v1 = vadd.f32 %v3617_v33, %v3241_v28  ;;  %v2898_v2 = vpop.f32.mrb[79].mxu1  ;;  %v2912_v27 = vmul.f32 0.5, %v2904_v49 }
0x146d   :  { %v2914_v44 = vmul.f32 0.044715, %v2896_v57  ;;  %v2899_v62 = vadd.f32 %v3241_v28, %v2898_v2  ;;  %v2910_v31 = vmul.f32 0.5, %v2896_v57 }
0x146e   :  { %v2920_v40 = vmul.f32 %v2916_v43, %v2904_v49  ;;  %v2917_v3 = vmul.f32 0.044715, %v2907_v1  ;;  %v2913_v29 = vmul.f32 0.5, %v2907_v1 }
0x146f   :  { %v2918_v53 = vmul.f32 %v2914_v44, %v2896_v57  ;;  %v2915_v4 = vmul.f32 0.044715, %v2899_v62  ;;  %v2911_v32 = vmul.f32 0.5, %v2899_v62 }
0x1470   :  { %v2924_v6 = vmul.f32 %v2920_v40, %v2904_v49  ;;  %v2921_v11 = vmul.f32 %v2917_v3, %v2907_v1 }
0x1471   :  { %v2922_v10 = vmul.f32 %v2918_v53, %v2896_v57  ;;  %v2919_v47 = vmul.f32 %v2915_v4, %v2899_v62 }
0x1472   :  { %v2928_v9 = vadd.f32 %v2924_v6, %v2904_v49  ;;  %v2925_v14 = vmul.f32 %v2921_v11, %v2907_v1 }
0x1473   :  { %v2926_v15 = vadd.f32 %v2922_v10, %v2896_v57  ;;  %v2923_v16 = vmul.f32 %v2919_v47, %v2899_v62 }
0x1474   :  { %v2932_v17 = vmul.f32 0.7978846, %v2928_v9  ;;  %v2929_v55 = vadd.f32 %v2925_v14, %v2907_v1 }
0x1475   :  { %v2930_v18 = vmul.f32 0.7978846, %v2926_v15  ;;  %v2927_v63 = vadd.f32 %v2923_v16, %v2899_v62 }
0x1476   :  { %3806 = vtanh.f32 %v2932_v17  ;;  %v2933_v26 = vmul.f32 0.7978846, %v2929_v55 }
0x1477   :  { %3808 = vtanh.f32 %v2930_v18  ;;  %v2931_v13 = vmul.f32 0.7978846, %v2927_v63 }
0x1478   :  { %3810 = vtanh.f32 %v2933_v26 }
0x1479   :  { %3812 = vtanh.f32 %v2931_v13 }
0x1480   :  { %v3807_v20 = vpop.eup %3806 }
0x1481   :  { %v3809_v23 = vpop.eup %3808  ;;  %v2940_v24 = vadd.f32 1.0, %v3807_v20 }
0x1482   :  { %v3811_v21 = vpop.eup %3810  ;;  %v2938_v5 = vadd.f32 1.0, %v3809_v23 }
0x1483   :  { %v3813_v7 = vpop.eup %3812  ;;  %v2941_v30 = vadd.f32 1.0, %v3811_v21  ;;  %v2944_v58 = vmul.f32 %v2940_v24, %v2912_v27 }
0x1484   :  { %v2939_v34 = vadd.f32 1.0, %v3813_v7  ;;  %v2942_v39 = vmul.f32 %v2938_v5, %v2910_v31  ;;  %v3264_v7 = vld [vmem:[%s4744_s14 + $0x1] ss:$0 sm:$0xff]  ;;  %s3927_s14 = smov [#allocation8]  }
0x1485   :  { %v2945_v35 = vmul.f32 %v2941_v30, %v2913_v29  ;;  %s3146_s28 = sshll.u32 %s3927_s14, 4  ;;  %s3147_s28 = int_to_ptr.vmem [resolvable:$true] %s3146_s28 }
0x1486   :  { %v2943_v60 = vmul.f32 %v2939_v34, %v2911_v32  ;;  %p3893_p11 = scmp.lt.s32.totalorder %s3147_s28, %s3147_s28 }
0x1487   :  { %v2947_v61 = vpack.c.bf16 %v2945_v35, %v2944_v58  ;;  %v3265_v58 = vld [vmem:[%s4745_s15 + $0x1] ss:$0 sm:$0xff]  ;;  %s3888_s15 = scalar_lea.vmem %s3147_s28, 64 }
0x1488   :  { %v2946_v22 = vpack.c.bf16 %v2943_v60, %v2942_v39  ;;  %p3889_p10 = scmp.ne.s32.totalorder %s3147_s28, %s3888_s15  ;;  %p3894_p12 = scmp.lt.s32.totalorder %s3888_s15, %s3888_s15 }
0x148a   :  { %3626 = vmatprep.mubr.msk.bf16.mxu0 %vm1534_vm5, %v2946_v22  ;;  %p3895_p13 = por %p3894_p12, %p3893_p11 }
0x148b   :  { %3627 = vmatmul.mubr.msk.bf16.vlgmr.msra.gmra.mrb[76].mxu0 %vm1534_vm5, %v2947_v61 }
0x148c   :  { %p3896_p0 = pnand %p3895_p13, %p3889_p10 }
0x155e   :  { %v3628_v36 = vpop.f32.mrb[76].mxu0 }
0x155f   :  { %v3038_v38 = vadd.f32 %v3628_v36, %v3255_v19  ;;  %v3029_v0 = vpop.f32.mrb[77].mxu0 }
0x1560   :  { %v3629_v45 = vpop.f32.mrb[78].mxu0  ;;  %v3030_v51 = vadd.f32 %v3255_v19, %v3029_v0 }
0x1561   :  { %v3046_v46 = vadd.f32 %v3038_v38, %v4673_v50  ;;  %v3041_v48 = vadd.f32 %v3629_v45, %v3255_v19  ;;  %v3032_v12 = vpop.f32.mrb[79].mxu0 }
0x1562   :  { %v3033_v54 = vadd.f32 %v3255_v19, %v3032_v12  ;;  %v3044_v28 = vadd.f32 %v3030_v51, %v4666_v41 }
0x1563   :  { %v3047_v52 = vadd.f32 %v3041_v48, %v4675_v37  ;;  %v3058_v8 = vsel %vm99_vm0, %v3046_v46, 0.0 }
0x1564   :  { %v3045_v59 = vadd.f32 %v3033_v54, %v4668_v42  ;;  %3059 = vadd.xlane.f32.xlu1 %v3058_v8  ;;  %v3052_v50 = vsel %vm99_vm0, %v3044_v28, 0.0 }
0x1565   :  { %v3061_v49 = vsel %vm99_vm0, %v3047_v52, 0.0 }
0x1566   :  { %v3055_v56 = vsel %vm99_vm0, %v3045_v59, 0.0 }
0x1567   :  { %3056 = vadd.xlane.f32.xlu0 %v3055_v56 }
0x1568   :  { %3062 = vadd.xlane.f32.xlu1 %v3061_v49 }
0x156b   :  { %3053 = vadd.xlane.f32.xlu0 %v3052_v50 }
0x15f1   :  { %v3060_v25 = vpop.xlane.xlu1 %3059 }
0x15f2   :  { %v3066_v57 = vmul.f32 0.03125, %v3060_v25 }
0x15f4   :  { %v3070_v33 = vsub.f32 %v3046_v46, %v3066_v57  ;;  %v3057_v37 = vpop.xlane.xlu0 %3056 }
0x15f5   :  { %v3065_v43 = vmul.f32 0.03125, %v3057_v37  ;;  %v3063_v1 = vpop.xlane.xlu1 %3062 }
0x15f6   :  { %v3067_v2 = vmul.f32 0.03125, %v3063_v1  ;;  %v3074_v42 = vmul.f32 %v3070_v33, %v3070_v33 }
0x15f7   :  { %v3069_v44 = vsub.f32 %v3045_v59, %v3065_v43 }
0x15f8   :  { %v3071_v62 = vsub.f32 %v3047_v52, %v3067_v2  ;;  %v3054_v41 = vpop.xlane.xlu0 %3053  ;;  %v3082_v40 = vsel %vm99_vm0, %v3074_v42, 0.0 }
0x15f9   :  { %v3064_v3 = vmul.f32 0.03125, %v3054_v41  ;;  %3083 = vadd.xlane.f32.xlu1 %v3082_v40  ;;  %v3073_v53 = vmul.f32 %v3069_v44, %v3069_v44 }
0x15fa   :  { %v3075_v4 = vmul.f32 %v3071_v62, %v3071_v62 }
0x15fb   :  { %v3068_v6 = vsub.f32 %v3044_v28, %v3064_v3  ;;  %v3079_v11 = vsel %vm99_vm0, %v3073_v53, 0.0 }
0x15fc   :  { %3080 = vadd.xlane.f32.xlu0 %v3079_v11  ;;  %v3085_v10 = vsel %vm99_vm0, %v3075_v4, 0.0 }
0x15fd   :  { %3086 = vadd.xlane.f32.xlu1 %v3085_v10  ;;  %v3072_v47 = vmul.f32 %v3068_v6, %v3068_v6 }
0x15ff   :  { %v3076_v9 = vsel %vm99_vm0, %v3072_v47, 0.0 }
0x1600   :  { %3077 = vadd.xlane.f32.xlu0 %v3076_v9 }
0x1686   :  { %v3084_v14 = vpop.xlane.xlu1 %3083 }
0x1687   :  { %v3090_v15 = vmul.f32 0.03125, %v3084_v14 }
0x1689   :  { %v3094_v16 = vadd.f32 1e-12, %v3090_v15  ;;  %v3081_v17 = vpop.xlane.xlu0 %3080 }
0x168a   :  { %v3089_v55 = vmul.f32 0.03125, %v3081_v17  ;;  %v3087_v18 = vpop.xlane.xlu1 %3086 }
0x168b   :  { %3814 = vrsqrt.f32 %v3094_v16  ;;  %v3091_v63 = vmul.f32 0.03125, %v3087_v18 }
0x168c   :  { %v3093_v26 = vadd.f32 1e-12, %v3089_v55 }
0x168d   :  { %v3095_v13 = vadd.f32 1e-12, %v3091_v63  ;;  %v3078_v20 = vpop.xlane.xlu0 %3077 }
0x168e   :  { %3816 = vrsqrt.f32 %v3093_v26  ;;  %v3088_v23 = vmul.f32 0.03125, %v3078_v20 }
0x168f   :  { %3818 = vrsqrt.f32 %v3095_v13 }
0x1690   :  { %v3092_v24 = vadd.f32 1e-12, %v3088_v23 }
0x1692   :  { %3820 = vrsqrt.f32 %v3092_v24 }
0x1695   :  { %v3815_v21 = vpop.eup %3814 }
0x1696   :  { %v3102_v5 = vmul.f32 %v3815_v21, %v3070_v33 }
0x1698   :  { %v3817_v27 = vpop.eup %3816  ;;  %v3112_v32 = vmul.f32 %v3264_v7, %v3102_v5 }
0x1699   :  { %v3819_v29 = vpop.eup %3818  ;;  %v3101_v30 = vmul.f32 %v3817_v27, %v3069_v44 }
0x169a   :  { %v3103_v31 = vmul.f32 %v3819_v29, %v3071_v62  ;;  %v3122_v22 = vadd.f32 %v3265_v58, %v3112_v32 }
0x169b   :  { %v3111_v34 = vmul.f32 %v3264_v7, %v3101_v30 }
0x169c   :  { %v3821_v35 = vpop.eup %3820  ;;  %v3113_v39 = vmul.f32 %v3264_v7, %v3103_v31  ;;  %v3131_v45 = vrot.slane %v3122_v22, 6 }
0x169d   :  { %v3100_v60 = vmul.f32 %v3821_v35, %v3068_v6  ;;  %v3121_v61 = vadd.f32 %v3265_v58, %v3111_v34 }
0x169e   :  { %v3123_v36 = vadd.f32 %v3265_v58, %v3113_v39 }
0x169f   :  { %v3110_v19 = vmul.f32 %v3264_v7, %v3100_v60  ;;  %v3128_v0 = vrot.slane %v3121_v61, 7 }
0x16a0   :  { %v3134_v48 = vrot.slane %v3123_v36, 5 }
0x16a1   :  { %v3120_v38 = vadd.f32 %v3265_v58, %v3110_v19 }
0x16a3   :  { %v3130_v46 = vsel %vm3129_vm6, %v3128_v0, %v3120_v38 }
0x16a4   :  { %v3133_v12 = vsel %vm3132_vm7, %v3131_v45, %v3130_v46 }
0x16a5   :  { %v3136_v51 = vsel %vm3135_vm8, %v3134_v48, %v3133_v12 }
0x16a6   :  { %3139 = vst.msk [vmem:[#allocation8] sm:$0xf] %vm3138_vm9, %v3136_v51 }
0x16a7   :  { %3899 = shalt.err (!%p3896_p0)
}
0x16a8   :  { %s3900_s1 = scalar_lea.hbm %s4746_s16, 64 }
0x16a9   :  { %p3901_p1 = scmp.ne.s32.totalorder %s4746_s16, %s3900_s1  ;;  %p3904_p2 = scmp.lt.u32.totalorder %s3900_s1, %s4746_s16 }
0x16ab   :  { %p3906_p3 = pnand %p3904_p2, %p3901_p1 }
0x16ad   :  { %3909 = shalt.err (!%p3906_p3)
}
0x16ae   :  { %3149 = dma.vmem_to_hbm [thread:$0]  %s3147_s28, 64, %s4746_s16, [#allocation4]  }
0x16af   :  { %3914 = dma.done.wait [#allocation4], 64  }
0x16b0   :  { %3915 = vsyncadd [#allocation4], 4294967232 }
0x16b1   :  { %3153 = vsyncpa [#allocation3], 1 }
0x16b2   :  { %3154 = vsyncpa [#allocation6], 1 }
0x16b3   :  { %3155 = vsyncpa [#allocation4], 1 }

</bundles_post_ra>
